<compile_context>
chip_gen: v7x
topology: tpu7x:2x2x1
jax: 0.10.0
libtpu: 0.0.40
codegen_flags: <defaults>
</compile_context>

<pallas_src>
import functools

import jax
import jax.numpy as jnp
from jax.experimental import pallas as pl
from jax.experimental.pallas import tpu as pltpu


def _round_up(x, m):
    return (x + m - 1) // m * m


_HALO = 16                                    # tile-aligned spatial halo in scratch
_NEG = float(jnp.finfo(jnp.bfloat16).min)     # finite min: safe maxpool pad value


# ----------------------------------------------------------------------------
# Kernels
# ----------------------------------------------------------------------------
def _stage1_kernel(x_ref, w_ref, b_ref, o_ref, xpad_ref, *, TH, H, W, Cin, C1):
    """Fused 1x1 heads of all four branches + the 3x3/s1/p1 maxpool.

    x_ref   : (1, H, W, Cin) bf16 unpadded image block (resident across r).
    w_ref   : (2*Cin, C1) bf16; rows [0:Cin] act on x, rows [Cin:] on pool(x).
    b_ref   : (1, C1) f32 folded conv-bias + BN shift.
    o_ref   : (1, TH, W, C1) bf16, channel layout [b1 | b2a | b3a | b4 | 0].
    xpad_ref: (H+2*HALO, W+2*HALO, Cin) bf16 scratch; built once per image at
              r == 0 (halo = bf16 finite min so the maxpool ignores it).
    """
    r = pl.program_id(1)

    @pl.when(r == 0)
    def _():
        xpad_ref[...] = jnp.full_like(xpad_ref, _NEG)
        xpad_ref[_HALO:_HALO + H, _HALO:_HALO + W, :] = x_ref[0]

    row0 = pl.multiple_of(r * TH, TH)
    base = _HALO - 1                                      # pool pad = 1

    # Separable 3x3 maxpool: max over the 3 tap-rows, then 3 column shifts.
    rmax = xpad_ref[pl.ds(row0 + base, TH), :, :]         # (TH, W+2*HALO, Cin)
    for kh in (1, 2):
        rmax = jnp.maximum(rmax, xpad_ref[pl.ds(row0 + base + kh, TH), :, :])
    pooled = jnp.maximum(
        jnp.maximum(rmax[:, base:base + W, :], rmax[:, base + 1:base + 1 + W, :]),
        rmax[:, base + 2:base + 2 + W, :])                # (TH, W, Cin)

    x_c = x_ref[0, pl.ds(row0, TH), :, :]                 # (TH, W, Cin)

    # One fused GEMM with K = 2*Cin over [x | maxpool(x)].
    lhs = jnp.concatenate([x_c.reshape(TH * W, Cin),
                           pooled.reshape(TH * W, Cin)], axis=-1)
    acc = jnp.dot(lhs, w_ref[...], preferred_element_type=jnp.float32)
    y = jnp.maximum(acc + b_ref[...], 0.0)                # f32 epilogue
    o_ref[...] = y.astype(o_ref.dtype).reshape(1, TH, W, C1)


def _stage2_kernel(y_ref, w3_ref, b3_ref, w5_ref, b5_ref, o_ref,
                   pad3_ref, pad5_ref, *,
                   TH, H, W, n1, n3r, n3, n5r, n5, pp, o2a, o3a, o4):
    """3x3 conv (b2b), 5x5 conv (b3b) and b1/b4 passthrough -> final concat.

    y_ref   : (1, H, W, C1) bf16 stage-1 features (resident across r).
    w3_ref  : (9*n3r, n3) bf16, rows ordered (kh*3 + kw)*n3r + ci.
    w5_ref  : (25*n5r, n5) bf16, rows ordered (kh*5 + kw)*n5r + ci.
    b3_ref  : (1, n3) f32.   b5_ref: (1, n5) f32.
    o_ref   : (1, TH, W, c_final) bf16 in torch.cat order [b1 | b2 | b3 | b4].
    pad3_ref: (H+2*HALO, W+2*HALO, n3r) bf16 zero-padded b2a channels.
    pad5_ref: (H+2*HALO, W+2*HALO, n5r) bf16 zero-padded b3a channels.
    """
    r = pl.program_id(1)

    @pl.when(r == 0)
    def _():
        img = y_ref[0]                                    # (H, W, C1)
        pad3_ref[...] = jnp.zeros_like(pad3_ref)
        pad5_ref[...] = jnp.zeros_like(pad5_ref)
        pad3_ref[_HALO:_HALO + H, _HALO:_HALO + W, :] = img[:, :, o2a:o2a + n3r]
        pad5_ref[_HALO:_HALO + H, _HALO:_HALO + W, :] = img[:, :, o3a:o3a + n5r]

    row0 = pl.multiple_of(r * TH, TH)

    def conv_branch(pad_ref, w_ref, b_ref, K, cin):
        """KxK 'same' conv as per-tap GEMM accumulation (contraction = cin)."""
        base = _HALO - (K - 1) // 2
        acc = None
        for kh in range(K):
            band = pad_ref[pl.ds(row0 + base + kh, TH), :, :]   # (TH, W+2H, cin)
            for kw in range(K):
                tap = band[:, base + kw:base + kw + W, :].reshape(TH * W, cin)
                t = kh * K + kw
                wk = w_ref[t * cin:(t + 1) * cin, :]
                d = jnp.dot(tap, wk, preferred_element_type=jnp.float32)
                acc = d if acc is None else acc + d
        return jnp.maximum(acc + b_ref[...], 0.0)               # f32 epilogue

    y3 = conv_branch(pad3_ref, w3_ref, b3_ref, 3, n3r)          # (TH*W, n3)
    y5 = conv_branch(pad5_ref, w5_ref, b5_ref, 5, n5r)          # (TH*W, n5)

    # b1 / b4 passthrough: plain copies (already ReLU'd in stage 1).
    band = y_ref[0, pl.ds(row0, TH), :, :]                      # (TH, W, C1)
    b1v = band[:, :, 0:n1].reshape(TH * W, n1)
    b4v = band[:, :, o4:o4 + pp].reshape(TH * W, pp)

    out = jnp.concatenate(
        [b1v, y3.astype(o_ref.dtype), y5.astype(o_ref.dtype), b4v], axis=-1)
    o_ref[...] = out.reshape(1, TH, W, n1 + n3 + n5 + pp)


# ----------------------------------------------------------------------------
# pallas_call wrappers
# ----------------------------------------------------------------------------
def _stage1_call(x, w1, bias1, *, TH):
    N, H, W, Cin = x.shape
    C1 = w1.shape[-1]
    kernel = functools.partial(_stage1_kernel, TH=TH, H=H, W=W, Cin=Cin, C1=C1)
    return pl.pallas_call(
        kernel,
        out_shape=jax.ShapeDtypeStruct((N, H, W, C1), jnp.bfloat16),
        grid=(N, H // TH),
        in_specs=[
            pl.BlockSpec((1, H, W, Cin), lambda n, r: (n, 0, 0, 0)),
            pl.BlockSpec((2 * Cin, C1), lambda n, r: (0, 0)),
            pl.BlockSpec((1, C1), lambda n, r: (0, 0)),
        ],
        out_specs=pl.BlockSpec((1, TH, W, C1), lambda n, r: (n, r, 0, 0)),
        scratch_shapes=[
            pltpu.VMEM((H + 2 * _HALO, W + 2 * _HALO, Cin), jnp.bfloat16)],
        compiler_params=pltpu.CompilerParams(
            dimension_semantics=("parallel", "arbitrary")),
    )(x, w1, bias1)


def _stage2_call(y1, params, *, TH):
    N, H, W, C1 = y1.shape
    d = params["dims"]
    kernel = functools.partial(
        _stage2_kernel, TH=TH, H=H, W=W,
        n1=d["n1"], n3r=d["n3r"], n3=d["n3"], n5r=d["n5r"], n5=d["n5"],
        pp=d["pp"], o2a=d["o2a"], o3a=d["o3a"], o4=d["o4"])
    w3, b3 = params["w3"], params["bias3"]
    w5, b5 = params["w5"], params["bias5"]
    return pl.pallas_call(
        kernel,
        out_shape=jax.ShapeDtypeStruct((N, H, W, d["c_final"]), jnp.bfloat16),
        grid=(N, H // TH),
        in_specs=[
            pl.BlockSpec((1, H, W, C1), lambda n, r: (n, 0, 0, 0)),
            pl.BlockSpec(w3.shape, lambda n, r: (0, 0)),
            pl.BlockSpec(b3.shape, lambda n, r: (0, 0)),
            pl.BlockSpec(w5.shape, lambda n, r: (0, 0)),
            pl.BlockSpec(b5.shape, lambda n, r: (0, 0)),
        ],
        out_specs=pl.BlockSpec((1, TH, W, d["c_final"]),
                               lambda n, r: (n, r, 0, 0)),
        scratch_shapes=[
            pltpu.VMEM((H + 2 * _HALO, W + 2 * _HALO, d["n3r"]), jnp.bfloat16),
            pltpu.VMEM((H + 2 * _HALO, W + 2 * _HALO, d["n5r"]), jnp.bfloat16),
        ],
        compiler_params=pltpu.CompilerParams(
            dimension_semantics=("parallel", "arbitrary")),
    )(y1, w3, b3, w5, b5)


# ----------------------------------------------------------------------------
# Parameter construction (deterministic, synthetic) + BN folding + fusion
# ----------------------------------------------------------------------------
def _make_convblock(key, cin, cout, k):
    """PyTorch-style Conv2d+BatchNorm2d params, BN (eval) folded into (w, bias)."""
    k1, k2, k3, k4, k5, k6 = jax.random.split(key, 6)
    w = jax.random.normal(k1, (cout, cin, k, k), jnp.float32) / jnp.sqrt(cin * k * k)
    conv_b = 0.1 * jax.random.normal(k2, (cout,), jnp.float32)
    gamma = 1.0 + 0.1 * jax.random.normal(k3, (cout,), jnp.float32)
    beta = 0.1 * jax.random.normal(k4, (cout,), jnp.float32)
    run_mean = 0.1 * jax.random.normal(k5, (cout,), jnp.float32)
    run_var = 0.5 + 0.1 * jnp.abs(jax.random.normal(k6, (cout,), jnp.float32))
    eps = 1e-5
    scale = gamma / jnp.sqrt(run_var + eps)
    w_hwio = jnp.transpose(w, (2, 3, 1, 0)) * scale      # fold BN scale into weights
    bias = (conv_b - run_mean) * scale + beta            # fold conv bias + BN shift
    return w_hwio, bias


def init_inception_params(key, in_channels, num1x1, num3x3_reduce, num3x3,
                          num5x5_reduce, num5x5, pool_proj):
    ks = jax.random.split(key, 6)
    cin = in_channels
    w_b1, b_b1 = _make_convblock(ks[0], cin, num1x1, 1)
    w_b2a, b_b2a = _make_convblock(ks[1], cin, num3x3_reduce, 1)
    w_b2b, b_b2b = _make_convblock(ks[2], num3x3_reduce, num3x3, 3)
    w_b3a, b_b3a = _make_convblock(ks[3], cin, num5x5_reduce, 1)
    w_b3b, b_b3b = _make_convblock(ks[4], num5x5_reduce, num5x5, 5)
    w_b4, b_b4 = _make_convblock(ks[5], cin, pool_proj, 1)

    # Stage-1 intermediate channel layout: [b1 | b2a | b3a | b4 | 0-pad], lane-dense.
    o2a = num1x1
    o3a = o2a + num3x3_reduce
    o4 = o3a + num5x5_reduce
    C1 = _round_up(max(o4 + pool_proj, 128), 128)
    w1 = jnp.zeros((2 * cin, C1), jnp.float32)
    w1 = w1.at[:cin, 0:num1x1].set(w_b1.reshape(cin, num1x1))
    w1 = w1.at[:cin, o2a:o2a + num3x3_reduce].set(w_b2a.reshape(cin, num3x3_reduce))
    w1 = w1.at[:cin, o3a:o3a + num5x5_reduce].set(w_b3a.reshape(cin, num5x5_reduce))
    w1 = w1.at[cin:, o4:o4 + pool_proj].set(w_b4.reshape(cin, pool_proj))
    bias1 = jnp.zeros((C1,), jnp.float32)
    bias1 = bias1.at[0:num1x1].set(b_b1)
    bias1 = bias1.at[o2a:o2a + num3x3_reduce].set(b_b2a)
    bias1 = bias1.at[o3a:o3a + num5x5_reduce].set(b_b3a)
    bias1 = bias1.at[o4:o4 + pool_proj].set(b_b4)

    # Stage-2 per-branch weights (no structural zeros), rows = (kh*K + kw)*Cin + ci.
    w3 = w_b2b.reshape(3 * 3 * num3x3_reduce, num3x3)
    w5 = w_b3b.reshape(5 * 5 * num5x5_reduce, num5x5)

    c_final = num1x1 + num3x3 + num5x5 + pool_proj

    params = {
        "w1": w1.astype(jnp.bfloat16),
        "bias1": bias1.reshape(1, C1),
        "w3": w3.astype(jnp.bfloat16),
        "bias3": b_b2b.reshape(1, num3x3),
        "w5": w5.astype(jnp.bfloat16),
        "bias5": b_b3b.reshape(1, num5x5),
        "dims": dict(n1=num1x1, n3r=num3x3_reduce, n3=num3x3,
                     n5r=num5x5_reduce, n5=num5x5, pp=pool_proj,
                     o2a=o2a, o3a=o3a, o4=o4, C1=C1, c_final=c_final),
    }
    # Unfused (but BN-folded) per-block weights for the pure-JAX reference.
    ref = {"b1": (w_b1, b_b1), "b2a": (w_b2a, b_b2a), "b2b": (w_b2b, b_b2b),
           "b3a": (w_b3a, b_b3a), "b3b": (w_b3b, b_b3b), "b4": (w_b4, b_b4)}
    return params, ref


# ----------------------------------------------------------------------------
# Full Inception forward (two fused pallas_calls)
# ----------------------------------------------------------------------------
def _pick_th(H, W, C, budget_bytes=4 << 20):
    """Largest divisor of H whose per-row-block f32 working set fits the budget."""
    th = H
    while th > 1 and th * W * C * 4 > budget_bytes:
        th -= 1
        while th > 1 and H % th != 0:
            th -= 1
    return max(th, 1)


def inception_forward(x_nchw, params):
    d = params["dims"]
    x = jnp.transpose(x_nchw, (0, 2, 3, 1)).astype(jnp.bfloat16)  # NCHW -> NHWC bf16
    N, H, W, _ = x.shape
    TH = _pick_th(H, W, max(d["C1"], d["c_final"]))
    assert H % TH == 0
    y1 = _stage1_call(x, params["w1"], params["bias1"], TH=TH)
    y2 = _stage2_call(y1, params, TH=TH)                          # (N,H,W,c_final) bf16
    # Upcast to f32 during the NCHW transpose (single epilogue pass).
    return jnp.transpose(y2, (0, 3, 1, 2)).astype(jnp.float32)


# ----------------------------------------------------------------------------
# Pure-JAX reference (eval-mode BN folded, f32) for a loose numerical check
# ----------------------------------------------------------------------------
def _ref_convblock(x, w, b):
    k = w.shape[0]
    p = (k - 1) // 2
    y = jax.lax.conv_general_dilated(
        x, w, window_strides=(1, 1), padding=[(p, p), (p, p)],
        dimension_numbers=("NHWC", "HWIO", "NHWC"))
    return jnp.maximum(y + b, 0.0)


def reference_forward(x_nchw, ref):
    x = jnp.transpose(x_nchw, (0, 2, 3, 1)).astype(jnp.float32)
    b1 = _ref_convblock(x, *ref["b1"])
    b2 = _ref_convblock(_ref_convblock(x, *ref["b2a"]), *ref["b2b"])
    b3 = _ref_convblock(_ref_convblock(x, *ref["b3a"]), *ref["b3b"])
    pooled = jax.lax.reduce_window(x, -jnp.inf, jax.lax.max,
                                   (1, 3, 3, 1), (1, 1, 1, 1),
                                   [(0, 0), (1, 1), (1, 1), (0, 0)])
    b4 = _ref_convblock(pooled, *ref["b4"])
    out = jnp.concatenate([b1, b2, b3, b4], axis=-1)
    return jnp.transpose(out, (0, 3, 1, 2))


if __name__ == "__main__":
    N, Cin, H, W = 2, 4, 16, 16
    num1x1, n3r, n3, n5r, n5, pp = 8, 4, 8, 4, 8, 8

    x = jax.random.normal(jax.random.PRNGKey(0), (N, Cin, H, W), jnp.float32)
    params, ref = init_inception_params(jax.random.PRNGKey(1), Cin,
                                        num1x1, n3r, n3, n5r, n5, pp)

    out = jax.block_until_ready(inception_forward(x, params))
    assert out.shape == (N, num1x1 + n3 + n5 + pp, H, W), out.shape
    assert bool(jnp.all(jnp.isfinite(out))) and bool(jnp.all(out >= 0.0))

    # Loose check vs pure-JAX f32 reference (kernel uses bf16 matmul inputs).
    expected = jax.block_until_ready(reference_forward(x, ref))
    max_err = float(jnp.max(jnp.abs(out - expected)))
    assert max_err < 0.3, f"max abs error too large: {max_err}"

    print("KERNEL_OK")
</pallas_src>

<mosaic_0001>
module attributes {stable_mosaic.version = 11 : i64} {
  func.func @_stage1_kernel(%arg0: i32, %arg1: i32, %arg2: memref<1x16x16x4xbf16, #tpu.memory_space<vmem>>, %arg3: memref<8x128xbf16, #tpu.memory_space<vmem>>, %arg4: memref<1x128xf32, #tpu.memory_space<vmem>>, %arg5: memref<1x16x16x128xbf16, #tpu.memory_space<vmem>>, %arg6: memref<48x48x4xbf16, #tpu.memory_space<vmem>>) attributes {dimension_semantics = [#tpu.dimension_semantics<parallel>, #tpu.dimension_semantics<arbitrary>], iteration_bounds = array<i64: 2, 1>, scalar_prefetch = 0 : i64, scratch_operands = 1 : i64, tpu.core_type = #tpu.core_type<tc>, window_params = [{transform_indices = @transform_0, window_bounds = array<i64: 1, 16, 16, 4>}, {pipeline_mode = #tpu.pipeline_mode<synchronous>, transform_indices = @transform_1, window_bounds = array<i64: 8, 128>}, {pipeline_mode = #tpu.pipeline_mode<synchronous>, transform_indices = @transform_2, window_bounds = array<i64: 1, 128>}, {transform_indices = @transform_3, window_bounds = array<i64: 1, 16, 16, 128>}]} {
    %c0_i32 = arith.constant 0 : i32
    %0 = arith.cmpi eq, %arg1, %c0_i32 : i32
    %1 = arith.extui %0 : i1 to i32
    %c0_i32_0 = arith.constant 0 : i32
    %2 = arith.cmpi ne, %1, %c0_i32_0 : i32
    scf.if %2 {
      %cst_20 = arith.constant -3.389530e+38 : bf16
      %39 = vector.broadcast %cst_20 : bf16 to vector<48x48x4xbf16>
      %c0_21 = arith.constant 0 : index
      %c0_22 = arith.constant 0 : index
      %c0_23 = arith.constant 0 : index
      %40 = vector.load %arg6[%c0_21, %c0_22, %c0_23] : memref<48x48x4xbf16, #tpu.memory_space<vmem>>, vector<48x48x4xbf16>
      tpu.vector_store %arg6[%c0_21, %c0_22, %c0_23], %39 {strides = array<i32>} : memref<48x48x4xbf16, #tpu.memory_space<vmem>>, vector<48x48x4xbf16>,
      %c0_24 = arith.constant 0 : index
      %c0_25 = arith.constant 0 : index
      %c0_26 = arith.constant 0 : index
      %c0_27 = arith.constant 0 : index
      %41 = vector.load %arg2[%c0_24, %c0_25, %c0_26, %c0_27] : memref<1x16x16x4xbf16, #tpu.memory_space<vmem>>, vector<1x16x16x4xbf16>
      %42 = vector.shape_cast %41 : vector<1x16x16x4xbf16> to vector<16x16x4xbf16>
      %c16 = arith.constant 16 : index
      %c16_28 = arith.constant 16 : index
      %c0_29 = arith.constant 0 : index
      %43 = vector.load %arg6[%c16, %c16_28, %c0_29] : memref<48x48x4xbf16, #tpu.memory_space<vmem>>, vector<16x16x4xbf16>
      tpu.vector_store %arg6[%c16, %c16_28, %c0_29], %42 {strides = array<i32>} : memref<48x48x4xbf16, #tpu.memory_space<vmem>>, vector<16x16x4xbf16>,
    } else {
    }
    %c16_i32 = arith.constant 16 : i32
    %3 = arith.muli %arg1, %c16_i32 : i32
    %4 = tpu.assume_multiple %3, 16 : i32
    %c15_i32 = arith.constant 15 : i32
    %5 = arith.addi %4, %c15_i32 : i32
    %6 = arith.index_cast %5 : i32 to index
    %c0 = arith.constant 0 : index
    %c0_1 = arith.constant 0 : index
    %7 = vector.load %arg6[%6, %c0, %c0_1] : memref<48x48x4xbf16, #tpu.memory_space<vmem>>, vector<16x48x4xbf16>
    %c15_i32_2 = arith.constant 15 : i32
    %8 = arith.addi %4, %c15_i32_2 : i32
    %c1_i32 = arith.constant 1 : i32
    %9 = arith.addi %8, %c1_i32 : i32
    %10 = arith.index_cast %9 : i32 to index
    %c0_3 = arith.constant 0 : index
    %c0_4 = arith.constant 0 : index
    %11 = vector.load %arg6[%10, %c0_3, %c0_4] : memref<48x48x4xbf16, #tpu.memory_space<vmem>>, vector<16x48x4xbf16>
    %12 = arith.maximumf %7, %11 : vector<16x48x4xbf16>
    %c15_i32_5 = arith.constant 15 : i32
    %13 = arith.addi %4, %c15_i32_5 : i32
    %c2_i32 = arith.constant 2 : i32
    %14 = arith.addi %13, %c2_i32 : i32
    %15 = arith.index_cast %14 : i32 to index
    %c0_6 = arith.constant 0 : index
    %c0_7 = arith.constant 0 : index
    %16 = vector.load %arg6[%15, %c0_6, %c0_7] : memref<48x48x4xbf16, #tpu.memory_space<vmem>>, vector<16x48x4xbf16>
    %17 = arith.maximumf %12, %16 : vector<16x48x4xbf16>
    %18 = vector.extract_strided_slice %17 {offsets = [0, 15, 0], sizes = [16, 16, 4], strides = [1, 1, 1]} : vector<16x48x4xbf16> to vector<16x16x4xbf16>
    %19 = vector.extract_strided_slice %17 {offsets = [0, 16, 0], sizes = [16, 16, 4], strides = [1, 1, 1]} : vector<16x48x4xbf16> to vector<16x16x4xbf16>
    %20 = arith.maximumf %18, %19 : vector<16x16x4xbf16>
    %21 = vector.extract_strided_slice %17 {offsets = [0, 17, 0], sizes = [16, 16, 4], strides = [1, 1, 1]} : vector<16x48x4xbf16> to vector<16x16x4xbf16>
    %22 = arith.maximumf %20, %21 : vector<16x16x4xbf16>
    %c0_8 = arith.constant 0 : index
    %23 = arith.index_cast %4 : i32 to index
    %c0_9 = arith.constant 0 : index
    %c0_10 = arith.constant 0 : index
    %24 = vector.load %arg2[%c0_8, %23, %c0_9, %c0_10] : memref<1x16x16x4xbf16, #tpu.memory_space<vmem>>, vector<1x16x16x4xbf16>
    %25 = vector.shape_cast %24 : vector<1x16x16x4xbf16> to vector<16x16x4xbf16>
    %26 = vector.shape_cast %25 : vector<16x16x4xbf16> to vector<256x4xbf16>
    %27 = vector.shape_cast %22 : vector<16x16x4xbf16> to vector<256x4xbf16>
    %28 = tpu.concatenate %26, %27 in 1 : vector<256x4xbf16>, vector<256x4xbf16> -> vector<256x8xbf16>
    %c0_11 = arith.constant 0 : index
    %c0_12 = arith.constant 0 : index
    %29 = vector.load %arg3[%c0_11, %c0_12] : memref<8x128xbf16, #tpu.memory_space<vmem>>, vector<8x128xbf16>
    %cst = arith.constant dense<0.000000e+00> : vector<256x128xf32>
    %30 = tpu.matmul %28, %29, %cst {dimension_numbers = #tpu.dot_dimension_numbers<[1], [0], [0], [1], [0, 0, 1, 1], [], []>} : vector<256x8xbf16>, vector<8x128xbf16>, vector<256x128xf32> -> vector<256x128xf32>
    %c0_13 = arith.constant 0 : index
    %c0_14 = arith.constant 0 : index
    %31 = vector.load %arg4[%c0_13, %c0_14] : memref<1x128xf32, #tpu.memory_space<vmem>>, vector<1x128xf32>
    %32 = vector.broadcast %31 : vector<1x128xf32> to vector<256x128xf32>
    %33 = arith.addf %30, %32 : vector<256x128xf32>
    %cst_15 = arith.constant 0.000000e+00 : f32
    %34 = vector.broadcast %cst_15 : f32 to vector<256x128xf32>
    %35 = arith.maximumf %33, %34 : vector<256x128xf32>
    %36 = arith.truncf %35 : vector<256x128xf32> to vector<256x128xbf16>
    %37 = vector.shape_cast %36 : vector<256x128xbf16> to vector<1x16x16x128xbf16>
    %c0_16 = arith.constant 0 : index
    %c0_17 = arith.constant 0 : index
    %c0_18 = arith.constant 0 : index
    %c0_19 = arith.constant 0 : index
    %38 = vector.load %arg5[%c0_16, %c0_17, %c0_18, %c0_19] : memref<1x16x16x128xbf16, #tpu.memory_space<vmem>>, vector<1x16x16x128xbf16>
    tpu.vector_store %arg5[%c0_16, %c0_17, %c0_18, %c0_19], %37 {strides = array<i32>} : memref<1x16x16x128xbf16, #tpu.memory_space<vmem>>, vector<1x16x16x128xbf16>,
    return
  }
  func.func @transform_0(%arg0: i32, %arg1: i32) -> (i32, i32, i32, i32) {
    %c0_i32 = arith.constant 0 : i32
    %c0_i32_0 = arith.constant 0 : i32
    %c0_i32_1 = arith.constant 0 : i32
    %c0_i32_2 = arith.constant 0 : i32
    return %arg0, %c0_i32, %c0_i32_0, %c0_i32_1 : i32, i32, i32, i32
  }
  func.func @transform_1(%arg0: i32, %arg1: i32) -> (i32, i32) {
    %c0_i32 = arith.constant 0 : i32
    %c0_i32_0 = arith.constant 0 : i32
    %c0_i32_1 = arith.constant 0 : i32
    return %c0_i32, %c0_i32_0 : i32, i32
  }
  func.func @transform_2(%arg0: i32, %arg1: i32) -> (i32, i32) {
    %c0_i32 = arith.constant 0 : i32
    %c0_i32_0 = arith.constant 0 : i32
    %c0_i32_1 = arith.constant 0 : i32
    return %c0_i32, %c0_i32_0 : i32, i32
  }
  func.func @transform_3(%arg0: i32, %arg1: i32) -> (i32, i32, i32, i32) {
    %c0_i32 = arith.constant 0 : i32
    %c0_i32_0 = arith.constant 0 : i32
    %c0_i32_1 = arith.constant 0 : i32
    return %arg0, %arg1, %c0_i32, %c0_i32_0 : i32, i32, i32, i32
  }
}

</mosaic_0001>

<bundles_post_ra>
// kernel: tpu_custom_call.1
= control target key start
LH: loop header
LB: loop body
LE: loop exit
PB: predicated region body
PF: predicated region fallthrough
CT: control target
= control target key end

     0   :  { %8 = vsyncpa [#allocation4], 0  ;;  %s3178_s0 = inlined_call_operand.vmem [shape: bf16[2,16,16,4], index: 0, kind: input, shape index: {}]   ;;  %s3179_s1 = inlined_call_operand.vmem [shape: bf16[8,128], index: 1, kind: input, shape index: {}]   ;;  %s3180_s2 = inlined_call_operand.vmem [shape: f32[1,128], index: 2, kind: input, shape index: {}]   ;;  %s3181_s3 = inlined_call_operand.hbm [shape: bf16[2,16,16,128], index: 3, kind: output, shape index: {}]  }
   0x1   :  { %10 = vsyncpa [#allocation4 + $0x1], 0  ;;  %s2561_s12 = smov 0   ;;  %s2563_s13 = smov 0  }
   0x2   :  { %s2565_s14 = smov 0   ;;  %s2567_s15 = smov 0  }
   0x3   :  { %s2569_s16 = smov 0   ;;  %s2571_s17 = smov 0  }
   0x4 LB: > { %s1945_s18 = sadd.s32 4294967295, %s2535_s17   ;;  %s1946_s19 = sadd.s32 4294967294, %s2535_s17   ;;  %s2535_s17 = sphi %s2571_s17, %s16_s17   ;;  %s2531_s16 = sphi %s2569_s16, %s3188_s16   ;;  %s2527_s15 = sphi %s2567_s15, %s3187_s15   ;;  %s2523_s14 = sphi %s2565_s14, %s3186_s14   ;;  %s2519_s13 = sphi %s2563_s13, %s3185_s13   ;;  %s2515_s12 = sphi %s2561_s12, %s3184_s12  }
   0x5   : > { %s28_s20 = sadd.s32 1, %s2531_s16  ;;  %s105_s21 = sadd.s32 1, %s2523_s14 }
   0x6   : > { %p30_p0 = scmp.ge.s32.totalorder %s28_s20, 2  ;;  %p115_p1 = scmp.ne.s32.totalorder %s2523_s14, %s2519_s13 }
   0x7   : > { %p116_p2 = scmp.eq.s32.totalorder %s1945_s18, 1  ;;  %p121_p3 = scmp.ne.s32.totalorder %s2519_s13, %s2515_s12 }
   0x8   : > { %s3190_s20 = smov (%p30_p0, %s28_s20), 0  ;;  %p122_p5 = scmp.eq.s32.totalorder %s1946_s19, 1 }
   0x9   : > { %p2601_p4 = por %p116_p2, %p115_p1  ;;  %s100_s23 = ssub.s32 %s2531_s16, %s3190_s20 }
   0xa   : > { %p1949_p6 = scmp.ge.s32.totalorder %s2535_s17, 1  ;;  %p103_p7 = scmp.eq.s32.totalorder %s100_s23, 0 }
   0xb   : > { %p2608_p8 = por %p122_p5, %p121_p3  ;;  %p154_p9 = scmp.lt.s32.totalorder %s2535_s17, 3 }
   0xc   : > { %s2614_s25 = scalar_select %p103_p7, %s2523_s14, %s105_s21  }
   0xd   : > { %p155_p10 = pnand %p1949_p6, %p154_p9 }
   0xe   : > { %p178_p11 = scmp.lt.s32.totalorder (!%p155_p10), %s2527_s15, 1  ;;  %vm190_vm0 = vcmask (!%p155_p10), 31744   ;;  %v2537_v0 = vmov (!%p155_p10), 4286578559   ;;  %v1443_v1 = vld [vmem:[%s3179_s1] sm:$0xf] (!%p155_p10) }
   0xf   : > { %158 = sbr.rel (%p155_p10) target bundleno = 503 (0x1f7), region = 32  ;;  %236 = vst.msk [vmem:[#allocation2 + $0x168] sm:$0xff] (!%p155_p10), %vm190_vm0, %v2537_v0  ;;  %237 = vst.msk [vmem:[#allocation2 + $0x170] sm:$0xff] (!%p155_p10), %vm190_vm0, %v2537_v0  ;;  %vm1484_vm1 = vcmask (!%p155_p10), 1043456   ;;  %vm941_vm2 = vcmask (!%p155_p10), 1046528   ;;  %s2538_s6 = smov (!%p155_p10), 4  }
  0x10   : > { %238 = vst.msk [vmem:[#allocation2 + $0x178] sm:$0xff] (!%p155_p10), %vm190_vm0, %v2537_v0  ;;  %239 = vst.msk [vmem:[#allocation2 + $0x180] sm:$0xff] (!%p155_p10), %vm190_vm0, %v2537_v0  ;;  %2365 = vmatprep.subr.msk.bf16.mxu0 (!%p155_p10), %vm1484_vm1, %v1443_v1  ;;  %v1486_v2 = vsel (!%p155_p10), %vm1484_vm1, %v1443_v1, 0  ;;  %2366 = vmatprep.subr.msk.bf16.mxu1 (!%p155_p10), %vm1484_vm1, %v1443_v1  ;;  %vm1089_vm3 = vsmask.f32 (!%p155_p10), 256  ;;  %vm1451_vm4 = vcmask (!%p155_p10), 64512  }
  0x11   : > { %240 = vst.msk [vmem:[#allocation2 + $0x188] sm:$0xff] (!%p155_p10), %vm190_vm0, %v2537_v0  ;;  %241 = vst.msk [vmem:[#allocation2 + $0x190] sm:$0xff] (!%p155_p10), %vm190_vm0, %v2537_v0  ;;  %2330 = vmatpush3.bf16.msra.mxu0 (!%p155_p10), %v1486_v2  ;;  %2364 = vmatpush3.bf16.msra.mxu1 (!%p155_p10), %v1486_v2  ;;  %s175_s9 = sand.u32 (!%p155_p10), 1, %s2519_s13   ;;  %s2216_s18 = sshll.u32 (!%p155_p10), %s2527_s15, 11 }
  0x12   : > { %242 = vst.msk [vmem:[#allocation2 + $0x198] sm:$0xff] (!%p155_p10), %vm190_vm0, %v2537_v0  ;;  %243 = vst.msk [vmem:[#allocation2 + $0x1a0] sm:$0xff] (!%p155_p10), %vm190_vm0, %v2537_v0  ;;  %s1950_s10 = sshll.u32 (!%p155_p10), %s175_s9, 7  ;;  %s3123_s26 = scalar_lea.hbm (!%p155_p10), %s3181_s3, %s2216_s18 }
  0x13   : > { %244 = vst.msk [vmem:[#allocation2 + $0x1a8] sm:$0xff] (!%p155_p10), %vm190_vm0, %v2537_v0  ;;  %245 = vst.msk [vmem:[#allocation2 + $0x1b0] sm:$0xff] (!%p155_p10), %vm190_vm0, %v2537_v0  ;;  %s3075_s11 = scalar_lea.vmem (!%p155_p10), [#allocation3], %s1950_s10 }
  0x14   : > { %246 = vst.msk [vmem:[#allocation2 + $0x1b8] sm:$0xff] (!%p155_p10), %vm190_vm0, %v2537_v0  ;;  %247 = vst.msk [vmem:[#allocation2 + $0x1c0] sm:$0xff] (!%p155_p10), %vm190_vm0, %v2537_v0  ;;  %s1858_s19 = sshll.u32 (!%p155_p10), %s3075_s11, 4  ;;  %s3125_s19 = int_to_ptr.vmem [resolvable:$true] %s1858_s19 }
  0x15   : > { %248 = vst.msk [vmem:[#allocation2 + $0x1c8] sm:$0xff] (!%p155_p10), %vm190_vm0, %v2537_v0  ;;  %249 = vst.msk [vmem:[#allocation2 + $0x1d0] sm:$0xff] (!%p155_p10), %vm190_vm0, %v2537_v0  ;;  %s2457_s27 = scalar_lea.vmem (!%p155_p10), %s3125_s19, 2048 }
  0x16   : > { %250 = vst.msk [vmem:[#allocation2 + $0x1d8] sm:$0xff] %vm190_vm0, %v2537_v0  ;;  %251 = vst.msk [vmem:[#allocation2 + $0x1e0] sm:$0xff] %vm190_vm0, %v2537_v0  ;;  %s179_s28 = scalar_select %p178_p11, %s2527_s15, 1  ;;  %v1969_v5 = vld [vmem:[#allocation2 + $0x168] sm:$0xff]  ;;  %v1970_v16 = vld [vmem:[#allocation2 + $0x170] sm:$0xff] }
  0x17   : > { %252 = vst.msk [vmem:[#allocation2 + $0x1e8] sm:$0xff] %vm190_vm0, %v2537_v0  ;;  %253 = vst.msk [vmem:[#allocation2 + $0x1f0] sm:$0xff] %vm190_vm0, %v2537_v0  ;;  %v1971_v6 = vld [vmem:[#allocation2 + $0x178] sm:$0xff]  ;;  %v2017_v7 = vld [vmem:[#allocation2 + $0x180] sm:$0xff]  ;;  %s3131_s15 = scalar_lea.sflag [#allocation4], %s175_s9  ;;  %p2458_p12 = scmp.ne.s32.totalorder %s3125_s19, %s2457_s27 }
  0x18   : > { %254 = vst.msk [vmem:[#allocation2 + $0x1f8] sm:$0xff] %vm190_vm0, %v2537_v0  ;;  %255 = vst.msk [vmem:[#allocation2 + $0x200] sm:$0xff] %vm190_vm0, %v2537_v0  ;;  %s2183_s29 = sshll.u32 %s179_s28, 7  ;;  %v2019_v8 = vld [vmem:[#allocation2 + $0x190] sm:$0xff]  ;;  %v585_v17 = vmax.bf16 %v2017_v7, %v1969_v5  ;;  %s2539_s28 = smov [#allocation3]  }
  0x19   : > { %256 = vst.msk [vmem:[#allocation2 + $0x208] sm:$0xff] %vm190_vm0, %v2537_v0  ;;  %257 = vst.msk [vmem:[#allocation2 + $0x210] sm:$0xff] %vm190_vm0, %v2537_v0  ;;  %s2680_s5 = scalar_lea.vmem %s3178_s0, %s2183_s29  ;;  %v2686_v9 = vld [vmem:[#allocation2 + $0x198] sm:$0xff]  ;;  %v587_v10 = vmax.bf16 %v2019_v8, %v1971_v6  ;;  %p2459_p13 = pnand %p2458_p12, %p2601_p4 }
  0x1a   : > { %258 = vst.msk [vmem:[#allocation2 + $0x218] sm:$0xff] %vm190_vm0, %v2537_v0  ;;  %259 = vst.msk [vmem:[#allocation2 + $0x220] sm:$0xff] %vm190_vm0, %v2537_v0  ;;  %v2425_v3 = vld [vmem:[%s2680_s5] sm:$0xff]   ;;  %v2426_v4 = vld [vmem:[%s2680_s5 + $0x8] sm:$0xff]   ;;  %v588_v18 = vmax.bf16 %v2686_v9, %v2017_v7  ;;  %v2714_v29 = vmax.bf16 %v2686_v9, %v585_v17  ;;  %s2461_s29 = sshll.u32 %s2539_s28, 4  ;;  %s2462_s29 = int_to_ptr.vmem [resolvable:$false] %s2461_s29 }
  0x1b   : > { %260 = vst.msk [vmem:[#allocation2 + $0x228] sm:$0xff] %vm190_vm0, %v2537_v0  ;;  %261 = vst.msk [vmem:[#allocation2 + $0x230] sm:$0xff] %vm190_vm0, %v2537_v0  ;;  %v2688_v11 = vld [vmem:[#allocation2 + $0x1a8] sm:$0xff]  ;;  %v2427_v12 = vld [vmem:[%s2680_s5 + $0x10] sm:$0xff]   ;;  %p2460_p0 = pneg %p2459_p13  ;;  %s2463_s30 = scalar_lea.vmem %s2462_s29, 4096 }
  0x1c   : > { %262 = vst.msk [vmem:[#allocation2 + $0x238] sm:$0xff] %vm190_vm0, %v2537_v0  ;;  %263 = vst.msk [vmem:[#allocation2 + $0x240] sm:$0xff] %vm190_vm0, %v2537_v0  ;;  %v590_v13 = vmax.bf16 %v2688_v11, %v2019_v8  ;;  %v2692_v14 = vld [vmem:[#allocation2 + $0x1b0] sm:$0xff]  ;;  %v2694_v15 = vld [vmem:[#allocation2 + $0x1c0] sm:$0xff]  ;;  %v687_v19 = vmax.bf16 %v2688_v11, %v587_v10  ;;  %p2464_p1 = scmp.lt.s32.totalorder %s3125_s19, %s2462_s29  ;;  %p2465_p2 = scmp.lt.s32.totalorder %s2463_s30, %s2457_s27 }
  0x1d   : > { %264 = vst.msk [vmem:[#allocation2 + $0x248] sm:$0xff] %vm190_vm0, %v2537_v0  ;;  %265 = vst.msk [vmem:[#allocation2 + $0x250] sm:$0xff] %vm190_vm0, %v2537_v0  ;;  %v2428_v20 = vld [vmem:[%s2680_s5 + $0x38] sm:$0xff]   ;;  %v2429_v21 = vld [vmem:[%s2680_s5 + $0x40] sm:$0xff]   ;;  %v2717_v30 = vmax.bf16 %v2692_v14, %v588_v18  ;;  %v591_v38 = vmax.bf16 %v2692_v14, %v2686_v9  ;;  %v593_v44 = vmax.bf16 %v2694_v15, %v2688_v11 }
  0x1e   : > { %266 = vst.msk [vmem:[#allocation2 + $0x258] sm:$0xff] %vm190_vm0, %v2537_v0  ;;  %267 = vst.msk [vmem:[#allocation2 + $0x260] sm:$0xff] %vm190_vm0, %v2537_v0  ;;  %v2430_v22 = vld [vmem:[%s2680_s5 + $0x48] sm:$0xff]   ;;  %v2703_v23 = vmax.bf16 %v2694_v15, %v590_v13  ;;  %v943_v39 = vrot.slane %v687_v19, 1  ;;  %v2431_v40 = vld [vmem:[%s2680_s5 + $0x50] sm:$0xff]   ;;  %p2466_p3 = por %p2465_p2, %p2464_p1 }
  0x1f   : > { %268 = vst.msk [vmem:[#allocation2 + $0x268] sm:$0xff] %vm190_vm0, %v2537_v0  ;;  %269 = vst.msk [vmem:[#allocation2 + $0x270] sm:$0xff] %vm190_vm0, %v2537_v0  ;;  %v2432_v53 = vld [vmem:[%s2680_s5 + $0x18] sm:$0xff]   ;;  %v2756_v54 = vld [vmem:[#allocation2 + $0x1c8] sm:$0xff] }
  0x20   : > { %270 = vst.msk [vmem:[#allocation2 + $0x278] sm:$0xff] %vm190_vm0, %v2537_v0  ;;  %271 = vst.msk [vmem:[#allocation2 + $0x280] sm:$0xff] %vm190_vm0, %v2537_v0  ;;  %v946_v46 = vrot.slane %v2703_v23, 1  ;;  %v2761_v61 = vld [vmem:[#allocation2 + $0x1d8] sm:$0xff]  ;;  %v2769_v1 = vmax.bf16 %v2756_v54, %v591_v38  ;;  %p2467_p5 = pnand %p2466_p3, %p2460_p0 }
  0x21   : > { %272 = vst.msk [vmem:[#allocation2 + $0x288] sm:$0xff] %vm190_vm0, %v2537_v0  ;;  %273 = vst.msk [vmem:[#allocation2 + $0x290] sm:$0xff] %vm190_vm0, %v2537_v0  ;;  %v2433_v2 = vld [vmem:[%s2680_s5 + $0x58] sm:$0xff]  }
  0x22   : > { %274 = vst.msk [vmem:[#allocation2 + $0x298] sm:$0xff] %vm190_vm0, %v2537_v0  ;;  %275 = vst.msk [vmem:[#allocation2 + $0x2a0] sm:$0xff] %vm190_vm0, %v2537_v0  ;;  %v2705_v24 = vld [vmem:[#allocation2 + $0x228] sm:$0xff] }
  0x23   : > { %276 = vst.msk [vmem:[#allocation2 + $0x2a8] sm:$0xff] %vm190_vm0, %v2537_v0  ;;  %277 = vst.msk [vmem:[#allocation2 + $0x2b0] sm:$0xff] %vm190_vm0, %v2537_v0  ;;  %v2707_v25 = vld [vmem:[#allocation2 + $0x238] sm:$0xff]  ;;  %v2709_v26 = vld [vmem:[#allocation2 + $0x240] sm:$0xff] }
  0x24   : > { %278 = vst.msk [vmem:[#allocation2 + $0x2b8] sm:$0xff] %vm190_vm0, %v2537_v0  ;;  %279 = vst.msk [vmem:[#allocation2 + $0x2c0] sm:$0xff] %vm190_vm0, %v2537_v0  ;;  %v2722_v31 = vld [vmem:[#allocation2 + $0x250] sm:$0xff]  ;;  %v609_v32 = vmax.bf16 %v2709_v26, %v2705_v24 }
  0x25   : > { %280 = vst.msk [vmem:[#allocation2 + $0x2c8] sm:$0xff] %vm190_vm0, %v2537_v0  ;;  %281 = vst.msk [vmem:[#allocation2 + $0x2d0] sm:$0xff] %vm190_vm0, %v2537_v0  ;;  %v611_v35 = vmax.bf16 %v2722_v31, %v2707_v25  ;;  %v2089_v36 = vld [vmem:[#allocation2 + $0x258] sm:$0xff] }
  0x26   : > { %282 = vst.msk [vmem:[#allocation2 + $0x2d8] sm:$0xff] %vm190_vm0, %v2537_v0  ;;  %283 = vst.msk [vmem:[#allocation2 + $0x2e0] sm:$0xff] %vm190_vm0, %v2537_v0  ;;  %v2091_v37 = vld [vmem:[#allocation2 + $0x268] sm:$0xff]  ;;  %v612_v41 = vmax.bf16 %v2089_v36, %v2709_v26  ;;  %v2734_v43 = vld [vmem:[#allocation2 + $0x270] sm:$0xff]  ;;  %v2740_v47 = vmax.bf16 %v2089_v36, %v609_v32 }
  0x27   : > { %284 = vst.msk [vmem:[#allocation2 + $0x2e8] sm:$0xff] %vm190_vm0, %v2537_v0  ;;  %285 = vst.msk [vmem:[#allocation2 + $0x2f0] sm:$0xff] %vm190_vm0, %v2537_v0  ;;  %v614_v42 = vmax.bf16 %v2091_v37, %v2722_v31  ;;  %v2742_v48 = vmax.bf16 %v2091_v37, %v611_v35  ;;  %v2744_v49 = vld [vmem:[#allocation2 + $0x280] sm:$0xff]  ;;  %v615_v55 = vmax.bf16 %v2734_v43, %v2089_v36 }
  0x28   : > { %286 = vst.msk [vmem:[#allocation2 + $0x2f8] sm:$0xff] %vm190_vm0, %v2537_v0  ;;  %287 = vst.msk [vmem:[#allocation2 + $0x300] sm:$0xff] %vm190_vm0, %v2537_v0  ;;  %v2750_v51 = vmax.bf16 %v2734_v43, %v612_v41  ;;  %v617_v56 = vmax.bf16 %v2744_v49, %v2091_v37 }
  0x29   : > { %288 = vst.msk [vmem:[#allocation2 + $0x308] sm:$0xff] %vm190_vm0, %v2537_v0  ;;  %289 = vst.msk [vmem:[#allocation2 + $0x310] sm:$0xff] %vm190_vm0, %v2537_v0  ;;  %v2753_v52 = vmax.bf16 %v2744_v49, %v614_v42  ;;  %v967_v62 = vrot.slane %v2742_v48, 1  ;;  %v2789_v17 = vld [vmem:[#allocation2 + $0x298] sm:$0xff] }
  0x2a   : > { %464 = vst.msk [vmem:[#allocation2 + $0x188] sm:$0xff] %vm190_vm0, %v2425_v3  ;;  %465 = vst.msk [vmem:[#allocation2 + $0x1a0] sm:$0xff] %vm190_vm0, %v2426_v4  ;;  %v2772_v3 = vld [vmem:[#allocation2 + $0x288] sm:$0xff] }
  0x2b   : > { %466 = vst.msk [vmem:[#allocation2 + $0x1b8] sm:$0xff] %vm190_vm0, %v2427_v12  ;;  %471 = vst.msk [vmem:[#allocation2 + $0x230] sm:$0xff] %vm190_vm0, %v2428_v20  ;;  %v970_v63 = vrot.slane %v2753_v52, 1 }
  0x2c   : > { %472 = vst.msk [vmem:[#allocation2 + $0x248] sm:$0xff] %vm190_vm0, %v2429_v21  ;;  %473 = vst.msk [vmem:[#allocation2 + $0x260] sm:$0xff] %vm190_vm0, %v2430_v22  ;;  %v2793_v21 = vmax.bf16 %v2772_v3, %v615_v55  ;;  %v2434_v22 = vld [vmem:[%s2680_s5 + $0x20] sm:$0xff]  }
  0x2d   : > { %474 = vst.msk [vmem:[#allocation2 + $0x278] sm:$0xff] %vm190_vm0, %v2431_v40  ;;  %467 = vst.msk [vmem:[#allocation2 + $0x1d0] sm:$0xff] %vm190_vm0, %v2432_v53 }
  0x2e   : > { %475 = vst.msk [vmem:[#allocation2 + $0x290] sm:$0xff] %vm190_vm0, %v2433_v2  ;;  %468 = vst.msk [vmem:[#allocation2 + $0x1e8] sm:$0xff] %vm190_vm0, %v2434_v22 }
  0x31   : > { %v2018_v27 = vld [vmem:[#allocation2 + $0x188] sm:$0xff]  ;;  %v2711_v28 = vld [vmem:[#allocation2 + $0x1a0] sm:$0xff] }
  0x32   : > { %v586_v33 = vmax.bf16 %v2018_v27, %v1970_v16  ;;  %v589_v34 = vmax.bf16 %v2711_v28, %v2018_v27  ;;  %v2746_v50 = vld [vmem:[#allocation2 + $0x1b8] sm:$0xff]  ;;  %v2775_v8 = vld [vmem:[#allocation2 + $0x230] sm:$0xff]  ;;  %v2786_v16 = vmax.bf16 %v2761_v61, %v593_v44  ;;  %v2436_v44 = vld [vmem:[%s2680_s5 + $0x28] sm:$0xff]  }
  0x33   : > { %v592_v0 = vmax.bf16 %v2746_v50, %v2711_v28  ;;  %v2777_v9 = vld [vmem:[#allocation2 + $0x248] sm:$0xff]  ;;  %v2779_v10 = vld [vmem:[#allocation2 + $0x260] sm:$0xff]  ;;  %469 = vst.msk [vmem:[#allocation2 + $0x200] sm:$0xff] %vm190_vm0, %v2436_v44 }
  0x34   : > { %v686_v45 = vmax.bf16 %v2711_v28, %v586_v33  ;;  %v689_v60 = vmax.bf16 %v2746_v50, %v589_v34  ;;  %v610_v12 = vmax.bf16 %v2777_v9, %v2775_v8  ;;  %v613_v13 = vmax.bf16 %v2779_v10, %v2777_v9  ;;  %v2435_v34 = vld [vmem:[%s2680_s5 + $0x60] sm:$0xff]   ;;  %v2804_v38 = vld [vmem:[#allocation2 + $0x278] sm:$0xff] }
  0x35   : > { %v949_v32 = vrot.slane %v2786_v16, 1  ;;  %v2800_v33 = vmax.bf16 %v2789_v17, %v617_v56  ;;  %476 = vst.msk [vmem:[#allocation2 + $0x2a8] sm:$0xff] %vm190_vm0, %v2435_v34  ;;  %v616_v52 = vmax.bf16 %v2804_v38, %v2779_v10 }
  0x36   : > { %v734_v57 = vshll.u32 %v686_v45, 16  ;;  %v737_v58 = vshrl.u32 %v686_v45, 16  ;;  %v942_v59 = vrot.slane %v686_v45, 1  ;;  %v741_v6 = vshll.u32 %v689_v60, 16 }
  0x37   : > { %v744_v7 = vshrl.u32 %v689_v60, 16  ;;  %v945_v11 = vrot.slane %v689_v60, 1  ;;  %v710_v27 = vmax.bf16 %v2779_v10, %v610_v12  ;;  %v713_v42 = vmax.bf16 %v2804_v38, %v613_v13 }
  0x38   : > { %v736_v4 = vrot.slane %v734_v57, 1  ;;  %v944_v5 = vsel %vm941_vm2, %v942_v59, %v943_v39  ;;  %v743_v20 = vrot.slane %v741_v6, 1 }
  0x39   : > { %v947_v23 = vsel %vm941_vm2, %v945_v11, %v946_v46  ;;  %v790_v39 = vshll.u32 %v710_v27, 16  ;;  %v793_v40 = vshrl.u32 %v710_v27, 16  ;;  %v966_v41 = vrot.slane %v710_v27, 1 }
  0x3a   : > { %v739_v18 = vor.u32 %v737_v58, %v736_v4  ;;  %v877_v19 = vmax.bf16 %v736_v4, %v2714_v29  ;;  %v746_v29 = vor.u32 %v744_v7, %v743_v20  ;;  %v879_v37 = vmax.bf16 %v743_v20, %v2717_v30 }
  0x3b   : > { %v792_v55 = vrot.slane %v790_v39, 1  ;;  %v968_v30 = vsel %vm941_vm2, %v966_v41, %v967_v62  ;;  %v797_v56 = vshll.u32 %v713_v42, 16  ;;  %v800_v57 = vshrl.u32 %v713_v42, 16 }
  0x3c   : > { %v878_v35 = vmax.bf16 %v739_v18, %v686_v45  ;;  %v1022_v36 = vmax.bf16 %v942_v59, %v877_v19  ;;  %v880_v53 = vmax.bf16 %v746_v29, %v689_v60  ;;  %v1024_v45 = vmax.bf16 %v945_v11, %v879_v37  ;;  %v2813_v60 = vld [vmem:[#allocation2 + $0x1d0] sm:$0xff]  ;;  %v2437_v11 = vld [vmem:[%s2680_s5 + $0x68] sm:$0xff]  }
  0x3d   : > { %v795_v7 = vor.u32 %v793_v40, %v792_v55  ;;  %v799_v12 = vrot.slane %v797_v56, 1  ;;  %v969_v19 = vrot.slane %v713_v42, 1  ;;  %477 = vst.msk [vmem:[#allocation2 + $0x2c0] sm:$0xff] %vm190_vm0, %v2437_v11  ;;  %v595_v16 = vmax.bf16 %v2813_v60, %v2746_v50 }
  0x3e   : > { %v1023_v46 = vmax.bf16 %v944_v5, %v878_v35  ;;  %v1091_v48 = vshrl.u32 %v1022_v36, 16  ;;  %v1025_v4 = vmax.bf16 %v947_v23, %v880_v53  ;;  %v1103_v6 = vshrl.u32 %v1024_v45, 16  ;;  %v2438_v23 = vld [vmem:[%s2680_s5 + $0x30] sm:$0xff]  }
  0x3f   : > { %v893_v5 = vmax.bf16 %v792_v55, %v2740_v47  ;;  %v894_v22 = vmax.bf16 %v795_v7, %v710_v27  ;;  %v802_v35 = vor.u32 %v800_v57, %v799_v12  ;;  %v895_v47 = vmax.bf16 %v799_v12, %v2750_v51  ;;  %470 = vst.msk [vmem:[#allocation2 + $0x218] sm:$0xff] %vm190_vm0, %v2438_v23 }
  0x40   : > { %v1093_v58 = vrot.slane %v1091_v48, 7  ;;  %v1095_v59 = vshrl.u32 %v1023_v46, 16  ;;  %v1098_v2 = vshll.u32 %v1023_v46, 16  ;;  %v1107_v18 = vshrl.u32 %v1025_v4, 16 }
  0x41   : > { %v1110_v62 = vshll.u32 %v1025_v4, 16  ;;  %v1105_v20 = vrot.slane %v1103_v6, 7  ;;  %v1038_v34 = vmax.bf16 %v966_v41, %v893_v5  ;;  %v971_v37 = vsel %vm941_vm2, %v969_v19, %v970_v63  ;;  %v2439_v41 = vld [vmem:[%s2680_s5 + $0x70] sm:$0xff]  }
  0x42   : > { %v1097_v13 = vrot.slane %v1095_v59, 7  ;;  %v1109_v29 = vrot.slane %v1107_v18, 7  ;;  %v1039_v39 = vmax.bf16 %v968_v30, %v894_v22  ;;  %v896_v44 = vmax.bf16 %v802_v35, %v713_v42  ;;  %v2831_v63 = vld [vmem:[#allocation2 + $0x290] sm:$0xff]  ;;  %478 = vst.msk [vmem:[#allocation2 + $0x2d8] sm:$0xff] %vm190_vm0, %v2439_v41  ;;  %v2849_v35 = vld [vmem:[#allocation2 + $0x1e8] sm:$0xff] }
  0x43   : > { %v1187_v40 = vshrl.u32 %v1038_v34, 16  ;;  %v692_v27 = vmax.bf16 %v2813_v60, %v592_v0  ;;  %v1040_v51 = vmax.bf16 %v969_v19, %v895_v47  ;;  %v2440_v0 = vld [vmem:[%s2680_s5 + $0x78] sm:$0xff]   ;;  %v716_v7 = vmax.bf16 %v2831_v63, %v616_v52  ;;  %v2847_v34 = vld [vmem:[#allocation2 + $0x1e0] sm:$0xff]  ;;  %v2857_v47 = vld [vmem:[#allocation2 + $0x1f0] sm:$0xff] }
  0x44   : > { %v1100_v36 = vor.u32 %v1098_v2, %v1097_v13  ;;  %v1112_v48 = vor.u32 %v1110_v62, %v1109_v29  ;;  %v1191_v28 = vshrl.u32 %v1039_v39, 16  ;;  %v1194_v53 = vshll.u32 %v1039_v39, 16  ;;  %479 = vst.msk [vmem:[#allocation2 + $0x2f0] sm:$0xff] %vm190_vm0, %v2440_v0  ;;  %v2866_v0 = vld [vmem:[#allocation2 + $0x2a0] sm:$0xff] }
  0x45   : > { %v1189_v42 = vrot.slane %v1187_v40, 7  ;;  %v1041_v45 = vmax.bf16 %v971_v37, %v896_v44  ;;  %v1199_v30 = vshrl.u32 %v1040_v51, 16  ;;  %v748_v56 = vshll.u32 %v692_v27, 16 }
  0x46   : > { %v1101_v46 = vsel %vm1089_vm3, %v1093_v58, %v1100_v36  ;;  %v1113_v55 = vsel %vm1089_vm3, %v1105_v20, %v1112_v48  ;;  %v751_v57 = vshrl.u32 %v692_v27, 16  ;;  %v1193_v10 = vrot.slane %v1191_v28, 7 }
  0x47   : > { %1362 = vrot.lane.b32.xlu0 %v1101_v46, %s2538_s6  ;;  %1364 = vrot.lane.b32.xlu1 %v1113_v55, %s2538_s6  ;;  %v1203_v58 = vshrl.u32 %v1041_v45, 16  ;;  %v1206_v59 = vshll.u32 %v1041_v45, 16  ;;  %v948_v2 = vrot.slane %v692_v27, 1  ;;  %v1201_v4 = vrot.slane %v1199_v30, 7 }
  0x48   : > { %v750_v6 = vrot.slane %v748_v56, 1  ;;  %v973_v5 = vrot.slane %v2800_v33, 1  ;;  %v1196_v12 = vor.u32 %v1194_v53, %v1193_v10  ;;  %v594_v18 = vmax.bf16 %v2756_v54, %v2692_v14 }
  0x49   : > { %v1205_v11 = vrot.slane %v1203_v58, 7  ;;  %v950_v13 = vsel %vm941_vm2, %v948_v2, %v949_v32  ;;  %v804_v20 = vshll.u32 %v716_v7, 16  ;;  %v807_v22 = vshrl.u32 %v716_v7, 16 }
  0x4a   : > { %v753_v62 = vor.u32 %v751_v57, %v750_v6  ;;  %v881_v19 = vmax.bf16 %v750_v6, %v2769_v1  ;;  %v1197_v33 = vsel %vm1089_vm3, %v1189_v42, %v1196_v12  ;;  %v972_v36 = vrot.slane %v716_v7, 1  ;;  %v2877_v12 = vld [vmem:[#allocation2 + $0x2b0] sm:$0xff] }
  0x4b   : > { %v1208_v23 = vor.u32 %v1206_v59, %v1205_v11  ;;  %1378 = vrot.lane.b32.xlu0 %v1197_v33, %s2538_s6  ;;  %v806_v29 = vrot.slane %v804_v20, 1  ;;  %v596_v1 = vmax.bf16 %v2761_v61, %v2694_v15  ;;  %v694_v40 = vmax.bf16 %v2847_v34, %v594_v18 }
  0x4c   : > { %v882_v32 = vmax.bf16 %v753_v62, %v692_v27  ;;  %v1026_v14 = vmax.bf16 %v948_v2, %v881_v19  ;;  %v974_v39 = vsel %vm941_vm2, %v972_v36, %v973_v5  ;;  %v695_v44 = vmax.bf16 %v2849_v35, %v595_v16  ;;  %v2874_v2 = vld [vmem:[#allocation2 + $0x2a8] sm:$0xff] }
  0x4d   : > { %v1209_v37 = vsel %vm1089_vm3, %v1201_v4, %v1208_v23  ;;  %v809_v27 = vor.u32 %v807_v22, %v806_v29  ;;  %v897_v46 = vmax.bf16 %v806_v29, %v2793_v21  ;;  %v696_v48 = vmax.bf16 %v2857_v47, %v596_v1  ;;  %v2888_v1 = vld [vmem:[#allocation2 + $0x200] sm:$0xff] }
  0x4e   : > { %1380 = vrot.lane.b32.xlu1 %v1209_v37, %s2538_s6  ;;  %v1027_v50 = vmax.bf16 %v950_v13, %v882_v32  ;;  %v1115_v41 = vshrl.u32 %v1026_v14, 16  ;;  %v755_v15 = vshll.u32 %v695_v44, 16  ;;  %v758_v51 = vshrl.u32 %v695_v44, 16  ;;  %v2890_v37 = vld [vmem:[#allocation2 + $0x208] sm:$0xff] }
  0x4f   : > { %v951_v52 = vrot.slane %v695_v44, 1  ;;  %v898_v45 = vmax.bf16 %v809_v27, %v716_v7  ;;  %v1042_v55 = vmax.bf16 %v972_v36, %v897_v46  ;;  %v952_v56 = vrot.slane %v696_v48, 1  ;;  %v2885_v36 = vld [vmem:[#allocation2 + $0x1f8] sm:$0xff] }
  0x50   : > { %v1117_v42 = vrot.slane %v1115_v41, 7  ;;  %v1119_v28 = vshrl.u32 %v1027_v50, 16  ;;  %v1122_v53 = vshll.u32 %v1027_v50, 16  ;;  %v757_v30 = vrot.slane %v755_v15, 1 }
  0x51   : > { %v618_v57 = vmax.bf16 %v2772_v3, %v2734_v43  ;;  %v1043_v58 = vmax.bf16 %v974_v39, %v898_v45  ;;  %v619_v21 = vmax.bf16 %v2831_v63, %v2804_v38  ;;  %v620_v59 = vmax.bf16 %v2789_v17, %v2744_v49  ;;  %v2901_v45 = vld [vmem:[#allocation2 + $0x2b8] sm:$0xff] }
  0x52   : > { %v1121_v10 = vrot.slane %v1119_v28, 7  ;;  %v1211_v4 = vshrl.u32 %v1042_v55, 16  ;;  %v760_v6 = vor.u32 %v758_v51, %v757_v30  ;;  %v883_v7 = vmax.bf16 %v757_v30, %v694_v40 }
  0x53   : > { %v953_v5 = vsel %vm941_vm2, %v951_v52, %v952_v56  ;;  %v1215_v13 = vshrl.u32 %v1043_v58, 16  ;;  %v1218_v43 = vshll.u32 %v1043_v58, 16  ;;  %v718_v18 = vmax.bf16 %v2866_v0, %v618_v57 }
  0x54   : > { %v1124_v11 = vor.u32 %v1122_v53, %v1121_v10  ;;  %v1213_v62 = vrot.slane %v1211_v4, 7  ;;  %v884_v19 = vmax.bf16 %v760_v6, %v695_v44  ;;  %v1028_v38 = vmax.bf16 %v951_v52, %v883_v7  ;;  %v2912_v4 = vld [vmem:[#allocation2 + $0x2c8] sm:$0xff] }
  0x55   : > { %v719_v20 = vmax.bf16 %v2874_v2, %v619_v21  ;;  %v1217_v22 = vrot.slane %v1215_v13, 7  ;;  %v720_v33 = vmax.bf16 %v2877_v12, %v620_v59  ;;  %v597_v23 = vmax.bf16 %v2847_v34, %v2756_v54  ;;  %v2910_v59 = vld [vmem:[#allocation2 + $0x2c0] sm:$0xff] }
  0x56   : > { %v1125_v49 = vsel %vm1089_vm3, %v1117_v42, %v1124_v11  ;;  %v1029_v16 = vmax.bf16 %v953_v5, %v884_v19  ;;  %v1127_v32 = vshrl.u32 %v1028_v38, 16  ;;  %v598_v50 = vmax.bf16 %v2849_v35, %v2813_v60 }
  0x57   : > { %1366 = vrot.lane.b32.xlu0 %v1125_v49, %s2538_s6  ;;  %v811_v14 = vshll.u32 %v719_v20, 16  ;;  %v814_v29 = vshrl.u32 %v719_v20, 16  ;;  %v1220_v39 = vor.u32 %v1218_v43, %v1217_v22  ;;  %v975_v40 = vrot.slane %v719_v20, 1 }
  0x58   : > { %v976_v44 = vrot.slane %v720_v33, 1  ;;  %v1129_v41 = vrot.slane %v1127_v32, 7  ;;  %v1131_v54 = vshrl.u32 %v1029_v16, 16  ;;  %v1134_v27 = vshll.u32 %v1029_v16, 16  ;;  %v2922_v33 = vld [vmem:[#allocation2 + $0x210] sm:$0xff] }
  0x59   : > { %v813_v46 = vrot.slane %v811_v14, 1  ;;  %v1221_v48 = vsel %vm1089_vm3, %v1213_v62, %v1220_v39  ;;  %v599_v51 = vmax.bf16 %v2857_v47, %v2761_v61  ;;  %v697_v52 = vmax.bf16 %v2885_v36, %v597_v23 }
  0x5a   : > { %v977_v15 = vsel %vm941_vm2, %v975_v40, %v976_v44  ;;  %1382 = vrot.lane.b32.xlu1 %v1221_v48, %s2538_s6  ;;  %v1133_v42 = vrot.slane %v1131_v54, 7  ;;  %v698_v60 = vmax.bf16 %v2888_v1, %v598_v50  ;;  %v621_v30 = vmax.bf16 %v2866_v0, %v2772_v3 }
  0x5b   : > { %v816_v28 = vor.u32 %v814_v29, %v813_v46  ;;  %v899_v53 = vmax.bf16 %v813_v46, %v718_v18  ;;  %v699_v55 = vmax.bf16 %v2890_v37, %v599_v51  ;;  %v622_v56 = vmax.bf16 %v2874_v2, %v2831_v63  ;;  %v2924_v29 = vld [vmem:[#allocation2 + $0x218] sm:$0xff] }
  0x5c   : > { %v623_v61 = vmax.bf16 %v2877_v12, %v2789_v17  ;;  %v1136_v57 = vor.u32 %v1134_v27, %v1133_v42  ;;  %v762_v21 = vshll.u32 %v698_v60, 16  ;;  %v765_v6 = vshrl.u32 %v698_v60, 16 }
  0x5d   : > { %v900_v10 = vmax.bf16 %v816_v28, %v719_v20  ;;  %v1044_v58 = vmax.bf16 %v975_v40, %v899_v53  ;;  %v954_v7 = vrot.slane %v698_v60, 1  ;;  %v955_v5 = vrot.slane %v699_v55, 1 }
  0x5e   : > { %v721_v11 = vmax.bf16 %v2901_v45, %v621_v30  ;;  %v1137_v3 = vsel %vm1089_vm3, %v1129_v41, %v1136_v57  ;;  %v764_v43 = vrot.slane %v762_v21, 1  ;;  %v722_v18 = vmax.bf16 %v2910_v59, %v622_v56  ;;  %v2928_v41 = vld [vmem:[#allocation2 + $0x220] sm:$0xff] }
  0x5f   : > { %v1045_v13 = vmax.bf16 %v977_v15, %v900_v10  ;;  %v1223_v63 = vshrl.u32 %v1044_v58, 16  ;;  %1368 = vrot.lane.b32.xlu0 %v1137_v3, %s2538_s6  ;;  %v956_v17 = vsel %vm941_vm2, %v954_v7, %v955_v5  ;;  %v723_v62 = vmax.bf16 %v2912_v4, %v623_v61 }
  0x60   : > { %v600_v19 = vmax.bf16 %v2885_v36, %v2847_v34  ;;  %v767_v22 = vor.u32 %v765_v6, %v764_v43  ;;  %v885_v23 = vmax.bf16 %v764_v43, %v697_v52  ;;  %v818_v16 = vshll.u32 %v722_v18, 16 }
  0x61   : > { %v1225_v38 = vrot.slane %v1223_v63, 7  ;;  %v1227_v20 = vshrl.u32 %v1045_v13, 16  ;;  %v1230_v49 = vshll.u32 %v1045_v13, 16  ;;  %v821_v32 = vshrl.u32 %v722_v18, 16  ;;  %v2942_v63 = vld [vmem:[#allocation2 + $0x2d0] sm:$0xff] }
  0x62   : > { %v978_v14 = vrot.slane %v722_v18, 1  ;;  %v886_v40 = vmax.bf16 %v767_v22, %v698_v60  ;;  %v979_v44 = vrot.slane %v723_v62, 1  ;;  %v601_v50 = vmax.bf16 %v2888_v1, %v2849_v35 }
  0x63   : > { %v1229_v39 = vrot.slane %v1227_v20, 7  ;;  %v1030_v34 = vmax.bf16 %v954_v7, %v885_v23  ;;  %v820_v54 = vrot.slane %v818_v16, 1  ;;  %v602_v27 = vmax.bf16 %v2890_v37, %v2857_v47 }
  0x64   : > { %v700_v46 = vmax.bf16 %v2922_v33, %v600_v19  ;;  %v1031_v15 = vmax.bf16 %v956_v17, %v886_v40  ;;  %v980_v51 = vsel %vm941_vm2, %v978_v14, %v979_v44  ;;  %v701_v52 = vmax.bf16 %v2924_v29, %v601_v50  ;;  %v2945_v19 = vld [vmem:[#allocation2 + $0x2d8] sm:$0xff] }
  0x65   : > { %v1232_v48 = vor.u32 %v1230_v49, %v1229_v39  ;;  %v1139_v42 = vshrl.u32 %v1030_v34, 16  ;;  %v823_v28 = vor.u32 %v821_v32, %v820_v54  ;;  %v901_v53 = vmax.bf16 %v820_v54, %v721_v11 }
  0x66   : > { %v702_v35 = vmax.bf16 %v2928_v41, %v602_v27  ;;  %v1143_v55 = vshrl.u32 %v1031_v15, 16  ;;  %v1146_v30 = vshll.u32 %v1031_v15, 16  ;;  %v769_v56 = vshll.u32 %v701_v52, 16 }
  0x67   : > { %v1233_v60 = vsel %vm1089_vm3, %v1225_v38, %v1232_v48  ;;  %v1141_v47 = vrot.slane %v1139_v42, 7  ;;  %v902_v61 = vmax.bf16 %v823_v28, %v722_v18  ;;  %v1046_v57 = vmax.bf16 %v978_v14, %v901_v53  ;;  %v2947_v38 = vld [vmem:[#allocation2 + $0x2e0] sm:$0xff] }
  0x68   : > { %1384 = vrot.lane.b32.xlu1 %v1233_v60, %s2538_s6  ;;  %v772_v10 = vshrl.u32 %v701_v52, 16  ;;  %v1145_v58 = vrot.slane %v1143_v55, 7  ;;  %v771_v21 = vrot.slane %v769_v56, 1  ;;  %v957_v6 = vrot.slane %v701_v52, 1 }
  0x69   : > { %v958_v7 = vrot.slane %v702_v35, 1  ;;  %v1047_v5 = vmax.bf16 %v980_v51, %v902_v61  ;;  %v1235_v3 = vshrl.u32 %v1046_v57, 16  ;;  %v624_v11 = vmax.bf16 %v2901_v45, %v2866_v0 }
  0x6a   : > { %v625_v13 = vmax.bf16 %v2910_v59, %v2874_v2  ;;  %v1148_v43 = vor.u32 %v1146_v30, %v1145_v58  ;;  %v774_v17 = vor.u32 %v772_v10, %v771_v21  ;;  %v887_v62 = vmax.bf16 %v771_v21, %v700_v46  ;;  %v2970_v10 = vld [vmem:[#allocation2 + $0x2e8] sm:$0xff]  ;;  %v2972_v58 = vld [vmem:[#allocation2 + $0x2f0] sm:$0xff] }
  0x6b   : > { %v959_v18 = vsel %vm941_vm2, %v957_v6, %v958_v7  ;;  %v1237_v20 = vrot.slane %v1235_v3, 7  ;;  %v1239_v49 = vshrl.u32 %v1047_v5, 16  ;;  %v1242_v22 = vshll.u32 %v1047_v5, 16 }
  0x6c   : > { %v626_v0 = vmax.bf16 %v2912_v4, %v2877_v12  ;;  %v1149_v23 = vsel %vm1089_vm3, %v1141_v47, %v1148_v43  ;;  %v888_v2 = vmax.bf16 %v774_v17, %v701_v52  ;;  %v1032_v16 = vmax.bf16 %v957_v6, %v887_v62  ;;  %v2978_v43 = vld [vmem:[#allocation2 + $0x2f8] sm:$0xff] }
  0x6d   : > { %v724_v32 = vmax.bf16 %v2942_v63, %v624_v11  ;;  %1370 = vrot.lane.b32.xlu0 %v1149_v23, %s2538_s6  ;;  %v1241_v14 = vrot.slane %v1239_v49, 7  ;;  %v725_v39 = vmax.bf16 %v2945_v19, %v625_v13  ;;  %v603_v44 = vmax.bf16 %v2922_v33, %v2885_v36 }
  0x6e   : > { %v726_v40 = vmax.bf16 %v2947_v38, %v626_v0  ;;  %v1033_v50 = vmax.bf16 %v959_v18, %v888_v2  ;;  %v1151_v34 = vshrl.u32 %v1032_v16, 16  ;;  %v604_v12 = vmax.bf16 %v2924_v29, %v2888_v1 }
  0x6f   : > { %v605_v54 = vmax.bf16 %v2928_v41, %v2890_v37  ;;  %v1244_v27 = vor.u32 %v1242_v22, %v1241_v14  ;;  %v825_v46 = vshll.u32 %v725_v39, 16  ;;  %v828_v48 = vshrl.u32 %v725_v39, 16 }
  0x70   : > { %v981_v15 = vrot.slane %v725_v39, 1  ;;  %v1153_v51 = vrot.slane %v1151_v34, 7  ;;  %v1155_v52 = vshrl.u32 %v1033_v50, 16  ;;  %v1158_v42 = vshll.u32 %v1033_v50, 16 }
  0x71   : > { %v982_v28 = vrot.slane %v726_v40, 1  ;;  %v1245_v53 = vsel %vm1089_vm3, %v1237_v20, %v1244_v27  ;;  %v827_v35 = vrot.slane %v825_v46, 1  ;;  %v703_v36 = vmax.bf16 %v2705_v24, %v603_v44 }
  0x72   : > { %v704_v60 = vmax.bf16 %v2775_v8, %v604_v12  ;;  %1386 = vrot.lane.b32.xlu1 %v1245_v53, %s2538_s6  ;;  %v1157_v1 = vrot.slane %v1155_v52, 7  ;;  %v705_v55 = vmax.bf16 %v2707_v25, %v605_v54  ;;  %v627_v30 = vmax.bf16 %v2942_v63, %v2901_v45 }
  0x73   : > { %v983_v37 = vsel %vm941_vm2, %v981_v15, %v982_v28  ;;  %v830_v56 = vor.u32 %v828_v48, %v827_v35  ;;  %v903_v47 = vmax.bf16 %v827_v35, %v724_v32  ;;  %v628_v5 = vmax.bf16 %v2945_v19, %v2910_v59 }
  0x74   : > { %v776_v61 = vshll.u32 %v704_v60, 16  ;;  %v779_v57 = vshrl.u32 %v704_v60, 16  ;;  %v1160_v21 = vor.u32 %v1158_v42, %v1157_v1  ;;  %v960_v6 = vrot.slane %v704_v60, 1 }
  0x75   : > { %v961_v7 = vrot.slane %v705_v55, 1  ;;  %v904_v3 = vmax.bf16 %v830_v56, %v725_v39  ;;  %v1048_v11 = vmax.bf16 %v981_v15, %v903_v47  ;;  %v629_v45 = vmax.bf16 %v2947_v38, %v2912_v4 }
  0x76   : > { %v778_v13 = vrot.slane %v776_v61, 1  ;;  %v1161_v17 = vsel %vm1089_vm3, %v1153_v51, %v1160_v21  ;;  %v727_v18 = vmax.bf16 %v2970_v10, %v627_v30  ;;  %v728_v20 = vmax.bf16 %v2972_v58, %v628_v5 }
  0x77   : > { %v962_v62 = vsel %vm941_vm2, %v960_v6, %v961_v7  ;;  %1372 = vrot.lane.b32.xlu0 %v1161_v17, %s2538_s6  ;;  %v1049_v49 = vmax.bf16 %v983_v37, %v904_v3  ;;  %v1247_v59 = vshrl.u32 %v1048_v11, 16  ;;  %v729_v23 = vmax.bf16 %v2978_v43, %v629_v45  ;;  %v2112_v7 = vld [vmem:[#allocation2 + $0x310] sm:$0xff] }
  0x78   : > { %v781_v22 = vor.u32 %v779_v57, %v778_v13  ;;  %v889_v0 = vmax.bf16 %v778_v13, %v703_v36  ;;  %v832_v2 = vshll.u32 %v728_v20, 16  ;;  %v835_v4 = vshrl.u32 %v728_v20, 16  ;;  %v2111_v57 = vld [vmem:[#allocation2 + $0x308] sm:$0xff] }
  0x79   : > { %v984_v16 = vrot.slane %v728_v20, 1  ;;  %v1249_v32 = vrot.slane %v1247_v59, 7  ;;  %v1251_v14 = vshrl.u32 %v1049_v49, 16  ;;  %v1254_v39 = vshll.u32 %v1049_v49, 16 }
  0x7a   : > { %v890_v40 = vmax.bf16 %v781_v22, %v704_v60  ;;  %v1034_v44 = vmax.bf16 %v960_v6, %v889_v0  ;;  %v834_v50 = vrot.slane %v832_v2, 1  ;;  %v985_v34 = vrot.slane %v729_v23, 1 }
  0x7b   : > { %v606_v12 = vmax.bf16 %v2922_v33, %v2705_v24  ;;  %v1253_v54 = vrot.slane %v1251_v14, 7  ;;  %v607_v46 = vmax.bf16 %v2924_v29, %v2775_v8  ;;  %v608_v48 = vmax.bf16 %v2928_v41, %v2707_v25 }
  0x7c   : > { %v1035_v27 = vmax.bf16 %v962_v62, %v890_v40  ;;  %v1163_v15 = vshrl.u32 %v1034_v44, 16  ;;  %v837_v51 = vor.u32 %v835_v4, %v834_v50  ;;  %v905_v52 = vmax.bf16 %v834_v50, %v727_v18 }
  0x7d   : > { %v1256_v42 = vor.u32 %v1254_v39, %v1253_v54  ;;  %v986_v35 = vsel %vm941_vm2, %v984_v16, %v985_v34  ;;  %v706_v24 = vmax.bf16 %v2709_v26, %v606_v12  ;;  %v707_v33 = vmax.bf16 %v2777_v9, %v607_v46 }
  0x7e   : > { %v1167_v28 = vshrl.u32 %v1035_v27, 16  ;;  %v1170_v53 = vshll.u32 %v1035_v27, 16  ;;  %v906_v36 = vmax.bf16 %v837_v51, %v728_v20  ;;  %v1050_v60 = vmax.bf16 %v984_v16, %v905_v52 }
  0x7f   : > { %v1257_v1 = vsel %vm1089_vm3, %v1249_v32, %v1256_v42  ;;  %v1165_v8 = vrot.slane %v1163_v15, 7  ;;  %v708_v25 = vmax.bf16 %v2722_v31, %v608_v48  ;;  %v783_v55 = vshll.u32 %v707_v33, 16 }
  0x80   : > { %v1169_v29 = vrot.slane %v1167_v28, 7  ;;  %1388 = vrot.lane.b32.xlu1 %v1257_v1, %s2538_s6  ;;  %v1051_v41 = vmax.bf16 %v986_v35, %v906_v36  ;;  %v1259_v37 = vshrl.u32 %v1050_v60, 16  ;;  %v786_v30 = vshrl.u32 %v707_v33, 16  ;;  %v2442_v35 = vld [vmem:[%s2680_s5] sm:$0xff]   ;;  %v2441_v36 = vld [vmem:[%s2680_s5 + $0x8] sm:$0xff]  }
  0x81   : > { %v963_v47 = vrot.slane %v707_v33, 1  ;;  %v964_v61 = vrot.slane %v708_v25, 1  ;;  %v631_v26 = vmax.bf16 %v2972_v58, %v2945_v19  ;;  %v785_v6 = vrot.slane %v783_v55, 1  ;;  %v2110_v19 = vld [vmem:[#allocation2 + $0x300] sm:$0xff] }
  0x82   : > { %v1172_v56 = vor.u32 %v1170_v53, %v1169_v29  ;;  %v1263_v9 = vshrl.u32 %v1051_v41, 16  ;;  %v1266_v21 = vshll.u32 %v1051_v41, 16  ;;  %v1261_v31 = vrot.slane %v1259_v37, 7  ;;  %v2443_v29 = vld [vmem:[%s2680_s5 + $0x48] sm:$0xff]  }
  0x83   : > { %v630_v3 = vmax.bf16 %v2970_v10, %v2942_v63  ;;  %v632_v11 = vmax.bf16 %v2978_v43, %v2947_v38  ;;  %v788_v45 = vor.u32 %v786_v30, %v785_v6  ;;  %v891_v17 = vmax.bf16 %v785_v6, %v706_v24  ;;  %v2445_v30 = vld [vmem:[%s2680_s5 + $0x10] sm:$0xff]  }
  0x84   : > { %v1173_v5 = vsel %vm1089_vm3, %v1165_v8, %v1172_v56  ;;  %v1265_v13 = vrot.slane %v1263_v9, 7  ;;  %v731_v58 = vmax.bf16 %v2111_v57, %v631_v26  ;;  %v965_v62 = vsel %vm941_vm2, %v963_v47, %v964_v61  ;;  %v2444_v8 = vld [vmem:[%s2680_s5 + $0x40] sm:$0xff]   ;;  %v2446_v61 = vld [vmem:[%s2680_s5 + $0x50] sm:$0xff]   ;;  %v2447_v9 = vld [vmem:[%s2680_s5 + $0x18] sm:$0xff]  }
  0x85   : > { %1374 = vrot.lane.b32.xlu0 %v1173_v5, %s2538_s6  ;;  %v732_v18 = vmax.bf16 %v2112_v7, %v632_v11  ;;  %v892_v49 = vmax.bf16 %v788_v45, %v707_v33  ;;  %v1036_v59 = vmax.bf16 %v963_v47, %v891_v17  ;;  %v730_v0 = vmax.bf16 %v2110_v19, %v630_v3  ;;  %v2448_v7 = vld [vmem:[%s2680_s5 + $0x58] sm:$0xff]   ;;  %v2449_v3 = vld [vmem:[%s2680_s5 + $0x20] sm:$0xff]  }
  0x86   : > { %v1268_v20 = vor.u32 %v1266_v21, %v1265_v13  ;;  %v839_v22 = vshll.u32 %v731_v58, 16  ;;  %v842_v23 = vshrl.u32 %v731_v58, 16  ;;  %v987_v63 = vrot.slane %v731_v58, 1  ;;  %v2450_v45 = vld [vmem:[%s2680_s5 + $0x60] sm:$0xff]  }
  0x87   : > { %v988_v10 = vrot.slane %v732_v18, 1  ;;  %v1037_v43 = vmax.bf16 %v965_v62, %v892_v49  ;;  %v1175_v2 = vshrl.u32 %v1036_v59, 16 }
  0x88   : > { %v1269_v38 = vsel %vm1089_vm3, %v1261_v31, %v1268_v20  ;;  %v841_v4 = vrot.slane %v839_v22, 1  ;;  %v2452_v20 = vld [vmem:[%s2680_s5 + $0x68] sm:$0xff]   ;;  %v2453_v22 = vld [vmem:[%s2680_s5 + $0x30] sm:$0xff]  }
  0x89   : > { %1390 = vrot.lane.b32.xlu1 %v1269_v38, %s2538_s6  ;;  %v1179_v16 = vshrl.u32 %v1037_v43, 16  ;;  %v1182_v32 = vshll.u32 %v1037_v43, 16  ;;  %v989_v40 = vsel %vm941_vm2, %v987_v63, %v988_v10  ;;  %v1177_v44 = vrot.slane %v1175_v2, 7  ;;  %v2455_v43 = vld [vmem:[%s2680_s5 + $0x38] sm:$0xff]  }
  0x8a   : > { %v844_v14 = vor.u32 %v842_v23, %v841_v4  ;;  %v907_v39 = vmax.bf16 %v841_v4, %v730_v0 }
  0x8b   : > { %v1181_v50 = vrot.slane %v1179_v16, 7  ;;  %v2456_v16 = vld [vmem:[%s2680_s5 + $0x78] sm:$0xff]  }
  0x8c   : > { %v908_v34 = vmax.bf16 %v844_v14, %v731_v58  ;;  %v1052_v12 = vmax.bf16 %v987_v63, %v907_v39  ;;  %v2451_v58 = vld [vmem:[%s2680_s5 + $0x28] sm:$0xff]   ;;  %v2454_v63 = vld [vmem:[%s2680_s5 + $0x70] sm:$0xff]   ;;  %v3065_v39 = vld [vmem:[%s3180_s2] ss:$0 sm:$0xff] }
  0x8d   : > { %v1184_v54 = vor.u32 %v1182_v32, %v1181_v50 }
  0x8e   : > { %v1053_v27 = vmax.bf16 %v989_v40, %v908_v34  ;;  %v1271_v46 = vshrl.u32 %v1052_v12, 16 }
  0x8f   : > { %v1185_v48 = vsel %vm1089_vm3, %v1177_v44, %v1184_v54 }
  0x90   : > { %v1275_v15 = vshrl.u32 %v1053_v27, 16  ;;  %v1278_v51 = vshll.u32 %v1053_v27, 16  ;;  %1376 = vrot.lane.b32.xlu0 %v1185_v48, %s2538_s6  ;;  %v1273_v52 = vrot.slane %v1271_v46, 7 }
  0x92   : > { %v1277_v42 = vrot.slane %v1275_v15, 7 }
  0x94   : > { %v1280_v28 = vor.u32 %v1278_v51, %v1277_v42 }
  0x96   : > { %v1281_v53 = vsel %vm1089_vm3, %v1273_v52, %v1280_v28 }
  0x97   : > { %1392 = vrot.lane.b32.xlu1 %v1281_v53, %s2538_s6 }
  0xb9   : > { %v1363_v60 = vpop.permute.xlu0 %1362  ;;  %v1365_v33 = vpop.permute.xlu1 %1364 }
  0xba   : > { %v1397_v24 = vsel %vm190_vm0, %v2442_v35, %v1363_v60  ;;  %v1400_v1 = vsel %vm190_vm0, %v2441_v36, %v1365_v33 }
  0xbb   : > { %2331 = vmatprep.mubr.msk.bf16.mxu0 %vm1451_vm4, %v1397_v24 }
  0xbc   : > { %2332 = vmatmul.mubr.msk.bf16.vlgmr.msra.gmra.mrb[0].mxu0 %vm1451_vm4, %v1400_v1 }
  0xbd   : > { %v1379_v25 = vpop.permute.xlu0 %1378 }
  0xbe   : > { %v1421_v41 = vsel %vm190_vm0, %v2444_v8, %v1379_v25 }
  0xbf   : > { %2347 = vmatprep.mubr.msk.bf16.mxu1 %vm1451_vm4, %v1421_v41 }
  0xc0   : > { %v1381_v37 = vpop.permute.xlu1 %1380 }
  0xc1   : > { %v1424_v55 = vsel %vm190_vm0, %v2443_v29, %v1381_v37 }
  0xc2   : > { %2348 = vmatmul.mubr.msk.bf16.vlgmr.msra.gmra.mrb[0].mxu1 %vm1451_vm4, %v1424_v55 }
  0xc9   : > { %v1367_v56 = vpop.permute.xlu0 %1366 }
  0xca   : > { %v1403_v47 = vsel %vm190_vm0, %v2445_v30, %v1367_v56 }
  0xcb   : > { %2335 = vmatprep.mubr.msk.bf16.mxu0 %vm1451_vm4, %v1403_v47 }
  0xcc   : > { %v1383_v26 = vpop.permute.xlu1 %1382 }
  0xcd   : > { %v1427_v57 = vsel %vm190_vm0, %v2446_v61, %v1383_v26 }
  0xce   : > { %2351 = vmatprep.mubr.msk.bf16.mxu1 %vm1451_vm4, %v1427_v57 }
  0xd1   : > { %v1369_v21 = vpop.permute.xlu0 %1368 }
  0xd2   : > { %v1406_v6 = vsel %vm190_vm0, %v2447_v9, %v1369_v21 }
  0xd3   : > { %2336 = vmatmul.mubr.msk.bf16.gmra.mrb[4].mxu0 %vm1451_vm4, %v1406_v6 }
  0xda   : > { %v1385_v5 = vpop.permute.xlu1 %1384 }
  0xdb   : > { %v1430_v31 = vsel %vm190_vm0, %v2448_v7, %v1385_v5 }
  0xdc   : > { %2352 = vmatmul.mubr.msk.bf16.gmra.mrb[4].mxu1 %vm1451_vm4, %v1430_v31 }
  0xdf   : > { %v1371_v11 = vpop.permute.xlu0 %1370 }
  0xe0   : > { %v1409_v13 = vsel %vm190_vm0, %v2449_v3, %v1371_v11 }
  0xe1   : > { %2339 = vmatprep.mubr.msk.bf16.mxu0 %vm1451_vm4, %v1409_v13 }
  0xe4   : > { %v1387_v17 = vpop.permute.xlu1 %1386 }
  0xe5   : > { %v1433_v19 = vsel %vm190_vm0, %v2450_v45, %v1387_v17 }
  0xe6   : > { %2355 = vmatprep.mubr.msk.bf16.mxu1 %vm1451_vm4, %v1433_v19 }
  0xe9   : > { %v1373_v62 = vpop.permute.xlu0 %1372 }
  0xea   : > { %v1412_v18 = vsel %vm190_vm0, %v2451_v58, %v1373_v62 }
  0xeb   : > { %2340 = vmatmul.mubr.msk.bf16.gmra.mrb[8].mxu0 %vm1451_vm4, %v1412_v18 }
  0xf2   : > { %v1389_v49 = vpop.permute.xlu1 %1388 }
  0xf3   : > { %v1436_v59 = vsel %vm190_vm0, %v2452_v20, %v1389_v49 }
  0xf4   : > { %2356 = vmatmul.mubr.msk.bf16.gmra.mrb[8].mxu1 %vm1451_vm4, %v1436_v59 }
  0xf7   : > { %v1375_v0 = vpop.permute.xlu0 %1374 }
  0xf8   : > { %v1415_v23 = vsel %vm190_vm0, %v2453_v22, %v1375_v0 }
  0xf9   : > { %2343 = vmatprep.mubr.msk.bf16.mxu0 %vm1451_vm4, %v1415_v23 }
  0xfb   : > { %v1391_v10 = vpop.permute.xlu1 %1390 }
  0xfc   : > { %v1439_v38 = vsel %vm190_vm0, %v2454_v63, %v1391_v10 }
  0xfd   : > { %2359 = vmatprep.mubr.msk.bf16.mxu1 %vm1451_vm4, %v1439_v38 }
 0x102   : > { %v1377_v2 = vpop.permute.xlu0 %1376 }
 0x103   : > { %v1418_v4 = vsel %vm190_vm0, %v2455_v43, %v1377_v2 }
 0x104   : > { %2344 = vmatmul.mubr.msk.bf16.gmra.mrb[12].mxu0 %vm1451_vm4, %v1418_v4 }
 0x109   : > { %v1393_v32 = vpop.permute.xlu1 %1392 }
 0x10a   : > { %v1442_v14 = vsel %vm190_vm0, %v2456_v16, %v1393_v32 }
 0x10b   : > { %2360 = vmatmul.mubr.msk.bf16.gmra.mrb[12].mxu1 %vm1451_vm4, %v1442_v14 }
 0x18f   : > { %v2333_v40 = vpop.f32.mrb[0].mxu0 }
 0x190   : > { %v1531_v44 = vadd.f32 %v2333_v40, %v3065_v39  ;;  %v1522_v50 = vpop.f32.mrb[1].mxu0 }
 0x191   : > { %v1523_v34 = vadd.f32 %v3065_v39, %v1522_v50  ;;  %v2334_v12 = vpop.f32.mrb[2].mxu0 }
 0x192   : > { %v1534_v54 = vadd.f32 %v2334_v12, %v3065_v39  ;;  %v1525_v27 = vpop.f32.mrb[3].mxu0  ;;  %v1651_v48 = vmax.f32 %v1531_v44, 0.0 }
 0x193   : > { %v1526_v46 = vadd.f32 %v3065_v39, %v1525_v27  ;;  %v1649_v51 = vmax.f32 %v1523_v34, 0.0 }
 0x194   : > { %v1652_v15 = vmax.f32 %v1534_v54, 0.0 }
 0x195   : > { %v1650_v52 = vmax.f32 %v1526_v46, 0.0  ;;  %v2349_v28 = vpop.f32.mrb[0].mxu1 }
 0x196   : > { %v2225_v42 = vpack.c.bf16 %v1652_v15, %v1651_v48  ;;  %v1595_v35 = vadd.f32 %v2349_v28, %v3065_v39  ;;  %v1586_v36 = vpop.f32.mrb[1].mxu1 }
 0x197   : > { %v2220_v53 = vpack.c.bf16 %v1650_v52, %v1649_v51  ;;  %v1587_v60 = vadd.f32 %v3065_v39, %v1586_v36  ;;  %v2350_v24 = vpop.f32.mrb[2].mxu1 }
 0x198   : > { %2297 = vst [vmem:[%s3075_s11 + $0x8] sm:$0xff] %v2225_v42   ;;  %v1598_v33 = vadd.f32 %v2350_v24, %v3065_v39  ;;  %v1589_v1 = vpop.f32.mrb[3].mxu1  ;;  %v1667_v29 = vmax.f32 %v1595_v35, 0.0 }
 0x199   : > { %2221 = vst [vmem:[%s3075_s11] sm:$0xff] %v2220_v53   ;;  %v1590_v8 = vadd.f32 %v3065_v39, %v1589_v1  ;;  %v1665_v41 = vmax.f32 %v1587_v60, 0.0 }
 0x19a   : > { %v1668_v25 = vmax.f32 %v1598_v33, 0.0 }
 0x19b   : > { %v1666_v37 = vmax.f32 %v1590_v8, 0.0 }
 0x19c   : > { %v2265_v55 = vpack.c.bf16 %v1668_v25, %v1667_v29 }
 0x19d   : > { %v2260_v30 = vpack.c.bf16 %v1666_v37, %v1665_v41 }
 0x19e   : > { %2305 = vst [vmem:[%s3075_s11 + $0x48] sm:$0xff] %v2265_v55  }
 0x19f   : > { %2304 = vst [vmem:[%s3075_s11 + $0x40] sm:$0xff] %v2260_v30  }
 0x1a6   : > { %v2337_v56 = vpop.f32.mrb[4].mxu0 }
 0x1a7   : > { %v1547_v47 = vadd.f32 %v2337_v56, %v3065_v39  ;;  %v1538_v61 = vpop.f32.mrb[5].mxu0 }
 0x1a8   : > { %v1539_v26 = vadd.f32 %v3065_v39, %v1538_v61  ;;  %v2338_v57 = vpop.f32.mrb[6].mxu0 }
 0x1a9   : > { %v1655_v9 = vmax.f32 %v1547_v47, 0.0  ;;  %v1550_v21 = vadd.f32 %v2338_v57, %v3065_v39  ;;  %v1541_v6 = vpop.f32.mrb[7].mxu0 }
 0x1aa   : > { %v1542_v7 = vadd.f32 %v3065_v39, %v1541_v6  ;;  %v1653_v31 = vmax.f32 %v1539_v26, 0.0 }
 0x1ab   : > { %v1656_v5 = vmax.f32 %v1550_v21, 0.0 }
 0x1ac   : > { %v1654_v3 = vmax.f32 %v1542_v7, 0.0 }
 0x1ad   : > { %v2235_v11 = vpack.c.bf16 %v1656_v5, %v1655_v9 }
 0x1ae   : > { %v2230_v45 = vpack.c.bf16 %v1654_v3, %v1653_v31 }
 0x1af   : > { %v2353_v13 = vpop.f32.mrb[4].mxu1  ;;  %2299 = vst [vmem:[%s3075_s11 + $0x18] sm:$0xff] %v2235_v11  }
 0x1b0   : > { %v1611_v17 = vadd.f32 %v2353_v13, %v3065_v39  ;;  %v1602_v19 = vpop.f32.mrb[5].mxu1  ;;  %2298 = vst [vmem:[%s3075_s11 + $0x10] sm:$0xff] %v2230_v45  }
 0x1b1   : > { %v1603_v58 = vadd.f32 %v3065_v39, %v1602_v19  ;;  %v2354_v62 = vpop.f32.mrb[6].mxu1 }
 0x1b2   : > { %v1614_v18 = vadd.f32 %v2354_v62, %v3065_v39  ;;  %v1605_v20 = vpop.f32.mrb[7].mxu1  ;;  %v1671_v59 = vmax.f32 %v1611_v17, 0.0 }
 0x1b3   : > { %v1606_v49 = vadd.f32 %v3065_v39, %v1605_v20  ;;  %v1669_v0 = vmax.f32 %v1603_v58, 0.0 }
 0x1b4   : > { %v1672_v22 = vmax.f32 %v1614_v18, 0.0 }
 0x1b5   : > { %v1670_v23 = vmax.f32 %v1606_v49, 0.0 }
 0x1b6   : > { %v2275_v63 = vpack.c.bf16 %v1672_v22, %v1671_v59 }
 0x1b7   : > { %v2270_v10 = vpack.c.bf16 %v1670_v23, %v1669_v0 }
 0x1b8   : > { %2307 = vst [vmem:[%s3075_s11 + $0x58] sm:$0xff] %v2275_v63  }
 0x1b9   : > { %2306 = vst [vmem:[%s3075_s11 + $0x50] sm:$0xff] %v2270_v10  }
 0x1be   : > { %v2341_v38 = vpop.f32.mrb[8].mxu0 }
 0x1bf   : > { %v1563_v43 = vadd.f32 %v2341_v38, %v3065_v39  ;;  %v1554_v2 = vpop.f32.mrb[9].mxu0 }
 0x1c0   : > { %v1555_v4 = vadd.f32 %v3065_v39, %v1554_v2  ;;  %v2342_v16 = vpop.f32.mrb[10].mxu0 }
 0x1c1   : > { %v1659_v32 = vmax.f32 %v1563_v43, 0.0  ;;  %v1566_v14 = vadd.f32 %v2342_v16, %v3065_v39  ;;  %v1557_v40 = vpop.f32.mrb[11].mxu0 }
 0x1c2   : > { %v1558_v44 = vadd.f32 %v3065_v39, %v1557_v40  ;;  %v1657_v34 = vmax.f32 %v1555_v4, 0.0 }
 0x1c3   : > { %v1660_v50 = vmax.f32 %v1566_v14, 0.0 }
 0x1c4   : > { %v1658_v12 = vmax.f32 %v1558_v44, 0.0 }
 0x1c5   : > { %v2245_v54 = vpack.c.bf16 %v1660_v50, %v1659_v32 }
 0x1c6   : > { %v2240_v27 = vpack.c.bf16 %v1658_v12, %v1657_v34 }
 0x1c7   : > { %v2357_v46 = vpop.f32.mrb[8].mxu1  ;;  %2301 = vst [vmem:[%s3075_s11 + $0x28] sm:$0xff] %v2245_v54  }
 0x1c8   : > { %v1627_v48 = vadd.f32 %v2357_v46, %v3065_v39  ;;  %v1618_v15 = vpop.f32.mrb[9].mxu1  ;;  %2300 = vst [vmem:[%s3075_s11 + $0x20] sm:$0xff] %v2240_v27  }
 0x1c9   : > { %v1619_v51 = vadd.f32 %v3065_v39, %v1618_v15  ;;  %v2358_v52 = vpop.f32.mrb[10].mxu1 }
 0x1ca   : > { %v1630_v42 = vadd.f32 %v2358_v52, %v3065_v39  ;;  %v1621_v28 = vpop.f32.mrb[11].mxu1  ;;  %v1675_v35 = vmax.f32 %v1627_v48, 0.0 }
 0x1cb   : > { %v1622_v53 = vadd.f32 %v3065_v39, %v1621_v28  ;;  %v1673_v60 = vmax.f32 %v1619_v51, 0.0 }
 0x1cc   : > { %v1676_v36 = vmax.f32 %v1630_v42, 0.0 }
 0x1cd   : > { %v1674_v24 = vmax.f32 %v1622_v53, 0.0 }
 0x1ce   : > { %v2285_v33 = vpack.c.bf16 %v1676_v36, %v1675_v35 }
 0x1cf   : > { %v2280_v1 = vpack.c.bf16 %v1674_v24, %v1673_v60 }
 0x1d0   : > { %2309 = vst [vmem:[%s3075_s11 + $0x68] sm:$0xff] %v2285_v33  }
 0x1d1   : > { %2308 = vst [vmem:[%s3075_s11 + $0x60] sm:$0xff] %v2280_v1  }
 0x1d7   : > { %v2345_v8 = vpop.f32.mrb[12].mxu0 }
 0x1d8   : > { %v1579_v29 = vadd.f32 %v2345_v8, %v3065_v39  ;;  %v1570_v25 = vpop.f32.mrb[13].mxu0 }
 0x1d9   : > { %v1571_v41 = vadd.f32 %v3065_v39, %v1570_v25  ;;  %v2346_v37 = vpop.f32.mrb[14].mxu0 }
 0x1da   : > { %v1663_v55 = vmax.f32 %v1579_v29, 0.0  ;;  %v1582_v30 = vadd.f32 %v2346_v37, %v3065_v39  ;;  %v1573_v56 = vpop.f32.mrb[15].mxu0 }
 0x1db   : > { %v1574_v47 = vadd.f32 %v3065_v39, %v1573_v56  ;;  %v1661_v26 = vmax.f32 %v1571_v41, 0.0 }
 0x1dc   : > { %v1664_v61 = vmax.f32 %v1582_v30, 0.0 }
 0x1dd   : > { %v1662_v9 = vmax.f32 %v1574_v47, 0.0 }
 0x1de   : > { %v2361_v57 = vpop.f32.mrb[12].mxu1  ;;  %v2255_v6 = vpack.c.bf16 %v1664_v61, %v1663_v55 }
 0x1df   : > { %v1643_v21 = vadd.f32 %v2361_v57, %v3065_v39  ;;  %v1634_v7 = vpop.f32.mrb[13].mxu1  ;;  %v2250_v31 = vpack.c.bf16 %v1662_v9, %v1661_v26 }
 0x1e0   : > { %v1635_v5 = vadd.f32 %v3065_v39, %v1634_v7  ;;  %v2362_v3 = vpop.f32.mrb[14].mxu1  ;;  %2303 = vst [vmem:[%s3075_s11 + $0x38] sm:$0xff] %v2255_v6  }
 0x1e1   : > { %v1646_v11 = vadd.f32 %v2362_v3, %v3065_v39  ;;  %v1637_v13 = vpop.f32.mrb[15].mxu1  ;;  %2302 = vst [vmem:[%s3075_s11 + $0x30] sm:$0xff] %v2250_v31   ;;  %v1679_v17 = vmax.f32 %v1643_v21, 0.0 }
 0x1e2   : > { %v1638_v45 = vadd.f32 %v3065_v39, %v1637_v13  ;;  %v1677_v58 = vmax.f32 %v1635_v5, 0.0 }
 0x1e3   : > { %v1680_v19 = vmax.f32 %v1646_v11, 0.0 }
 0x1e4   : > { %v1678_v62 = vmax.f32 %v1638_v45, 0.0 }
 0x1e5   : > { %v2295_v18 = vpack.c.bf16 %v1680_v19, %v1679_v17 }
 0x1e6   : > { %v2290_v20 = vpack.c.bf16 %v1678_v62, %v1677_v58 }
 0x1e7   : > { %2311 = vst [vmem:[%s3075_s11 + $0x78] sm:$0xff] %v2295_v18  }
 0x1e8   : > { %2310 = vst [vmem:[%s3075_s11 + $0x70] sm:$0xff] %v2290_v20  }
 0x1e9   : > { %2470 = shalt.err (!%p2467_p5)
}
 0x1ea   : > { %s2471_s4 = scalar_lea.hbm %s3123_s26, 2048  ;;  %s2475_s8 = scalar_lea.hbm %s3181_s3, 4096 }
 0x1eb   : > { %p2472_p6 = scmp.ne.s32.totalorder %s3123_s26, %s2471_s4  ;;  %p2476_p10 = scmp.lt.u32.totalorder %s3123_s26, %s3181_s3 }
 0x1ec   : > { %p2477_p11 = scmp.lt.u32.totalorder %s2475_s8, %s2471_s4  ;;  %p2479_p13 = scmp.lt.u32.totalorder %s2471_s4, %s3123_s26 }
 0x1ed   : > { %p2473_p7 = pnand %p2472_p6, %p2601_p4 }
 0x1ee   : > { %p2478_p12 = por %p2477_p11, %p2476_p10 }
 0x1ef   : > { %p2474_p9 = pneg %p2473_p7 }
 0x1f0   : > { %p2480_p0 = por %p2479_p13, %p2478_p12 }
 0x1f2   : > { %p2481_p1 = pnand %p2480_p0, %p2474_p9 }
 0x1f4   : > { %2484 = shalt.err (!%p2481_p1)
}
 0x1f5   : > { %s2540_s11 = smov 64  }
 0x1f6   : > { %2367 = dma.vmem_to_hbm [thread:$0]  (%p2601_p4), %s3125_s19, 2048, %s3123_s26, %s3131_s15, %s2540_s11, %s2540_s11, %s2538_s6  }
 0x1f7 PF: > { %p2373_p2 = scmp.ge.s32.totalorder %s2535_s17, 2  ;;  %s1873_s18 = sand.u32 1, %s2515_s12  }
 0x1f8   : > { %s1874_s21 = scalar_lea.sflag [#allocation4], %s1873_s18 }
 0x1f9   : > { %p2370_p3 = pnand %p2373_p2, %p2608_p8 }
 0x1fb   : > { %2510 = dma.done.wait (!%p2370_p3), %s1874_s21, 2048  }
 0x1fc   : > { %2512 = vsyncadd (!%p2370_p3), %s1874_s21, 4294965248  ;;  %s16_s17 = sadd.s32 1, %s2535_s17   ;;  %s3184_s12 = smov %s2519_s13 }
 0x1fd   : > { %p13_p5 = scmp.ge.s32.totalorder %s16_s17, 4   ;;  %s3185_s13 = smov %s2523_s14 }
 0x1fe   : > { %s3186_s14 = smov %s2614_s25  ;;  %s3187_s15 = smov %s2531_s16 }
 0x1ff   : > { %s3188_s16 = smov %s3190_s20  ;;  %15 = sbr.rel (!%p13_p5) target bundleno = 4 (0x4), region = 76 }
 0x206   :  { %1879 = vsyncpa [#allocation4], 1 }
 0x207   :  { %1881 = vsyncpa [#allocation4 + $0x1], 1 }

</bundles_post_ra>
